<compile_context>
chip_gen: v6e
topology: v6e:2x2x1
jax: 0.10.0
libtpu: 0.0.40
codegen_flags: <defaults>
</compile_context>

<pallas_src>
import jax
import jax.numpy as jnp
from jax.experimental import pallas as pl
from jax.experimental.pallas import tpu as pltpu


# ----------------------------------------------------------------------------
# Fused kernel: one batch sample per grid step, all layers in VMEM.
# ----------------------------------------------------------------------------
def _fused_kernel(x_ref,
                  w1, b1, w2, b2, w3, b3, w4, b4, w5, b5, w6, b6,
                  wd, bd, wha, bha, whb, bhb,
                  o_ref):
    bf16 = jnp.bfloat16
    f32 = jnp.float32

    def pool_relu(acc):
        # MaxPool1d(2,2) (floor) + ReLU on an (L, C) f32 tile.
        l, c = acc.shape
        lp = l // 2
        r = acc[:2 * lp, :].reshape(lp, 2, c)
        return jnp.maximum(jnp.maximum(r[:, 0, :], r[:, 1, :]), 0.0)

    def conv3(a, w_ref, b_ref):
        # Conv1d(k=3, s=1, p=1) as ONE K=3*C_in matmul + MaxPool(2,2) + ReLU.
        l, c_in = a.shape
        zr = jnp.zeros((1, c_in), f32)
        xp = jnp.concatenate([zr, a, zr], axis=0)                    # (L+2, C_in)
        x3 = jnp.concatenate([xp[0:l], xp[1:l + 1], xp[2:l + 2]],
                             axis=1)                                  # (L, 3*C_in)
        acc = jnp.dot(x3.astype(bf16), w_ref[...],
                      preferred_element_type=f32) + b_ref[...]
        return pool_relu(acc)

    # conv1: im2col (L_out, 64) @ (64, 16), single K=64 MXU push.
    acc = jnp.dot(x_ref[0], w1[...], preferred_element_type=f32) + b1[...]
    a = pool_relu(acc)                       # (32, 16)

    a = conv3(a, w2, b2)                     # (16, 32)
    a = conv3(a, w3, b3)                     # (8, 64)
    a = conv3(a, w4, b4)                     # (4, 64)
    a = conv3(a, w5, b5)                     # (2, 64)
    a = conv3(a, w6, b6)                     # (1, 64)

    # AdaptiveAvgPool1d(1) + dense(64 -> 109) + fused 3-head MLP.
    feat = jnp.mean(a, axis=0, keepdims=True)                         # (1, 64)
    enc = jnp.dot(feat.astype(bf16), wd[...],
                  preferred_element_type=f32) + bd[...]               # (1, 109)
    h = jnp.maximum(
        jnp.dot(enc.astype(bf16), wha[...],
                preferred_element_type=f32) + bha[...], 0.0)          # (1, 384)
    out = jnp.dot(h.astype(bf16), whb[...],
                  preferred_element_type=f32) + bhb[...]              # (1, 11)
    o_ref[0] = out


# ----------------------------------------------------------------------------
# pallas_call wrapper + glue
# ----------------------------------------------------------------------------
def _fused_call(xcol, kp):
    n, l_out, kwidth = xcol.shape
    weights = [kp['w1'], kp['b1'],
               kp['w2'], kp['b2'], kp['w3'], kp['b3'],
               kp['w4'], kp['b4'], kp['w5'], kp['b5'], kp['w6'], kp['b6'],
               kp['wd'], kp['bd'], kp['wha'], kp['bha'], kp['whb'], kp['bhb']]

    def resident(arr):
        # Full-array block with a constant block index: fetched once, stays in VMEM.
        return pl.BlockSpec(arr.shape, lambda i, _nd=arr.ndim: (0,) * _nd)

    return pl.pallas_call(
        _fused_kernel,
        out_shape=jax.ShapeDtypeStruct((n, 1, 11), jnp.float32),
        grid=(n,),
        in_specs=[pl.BlockSpec((1, l_out, kwidth), lambda i: (i, 0, 0))]
                 + [resident(w) for w in weights],
        out_specs=pl.BlockSpec((1, 1, 11), lambda i: (i, 0, 0)),
        compiler_params=pltpu.CompilerParams(dimension_semantics=("parallel",)),
    )(xcol, *weights)


def _pack_kernel_params(p):
    """Repack f32 matmul-layout params into the fused-kernel bf16 layout."""
    bf = jnp.bfloat16
    kp = {'w1': p['w1'].astype(bf), 'b1': p['b1']}
    for i in range(2, 7):
        w = p[f'w{i}']                                        # (3, C_in, C_out)
        kp[f'w{i}'] = w.reshape(w.shape[0] * w.shape[1], w.shape[2]).astype(bf)
        kp[f'b{i}'] = p[f'b{i}']
    kp['wd'] = p['wd'].astype(bf)
    kp['bd'] = p['bd']
    # Heads: first layers concatenated along the output dim (one K=109 matmul),
    # second layers block-diagonal so the three logits land lane-contiguous.
    kp['wha'] = jnp.concatenate(
        [p['w_size_a'], p['w_type_a'], p['w_load_a']], axis=1).astype(bf)   # (109, 384)
    kp['bha'] = jnp.concatenate(
        [p['b_size_a'], p['b_type_a'], p['b_load_a']], axis=1)              # (1, 384)
    whb = jnp.zeros((384, 11), jnp.float32)
    whb = whb.at[0:128, 0:4].set(p['w_size_b'])
    whb = whb.at[128:256, 4:8].set(p['w_type_b'])
    whb = whb.at[256:384, 8:11].set(p['w_load_b'])
    kp['whb'] = whb.astype(bf)
    kp['bhb'] = jnp.concatenate(
        [p['b_size_b'], p['b_type_b'], p['b_load_b']], axis=1)              # (1, 11)
    return kp


def wdcnnc_forward(x, p):
    """x: (N, 1, L) float32, PyTorch NCW convention. Returns (x1, x2, x3)."""
    n, _, length = x.shape
    kp = _pack_kernel_params(p)

    # conv1 im2col glue (one-time, lane-dense): pad by 32 each side, view as
    # stride-8 rows, concatenate 8 shifted slices along lanes -> (N, L_out, 64)
    # with column index k = conv tap index.
    xp = jnp.pad(x[:, 0, :], ((0, 0), (32, 32)))
    lp8 = (length + 64) // 8
    xv = xp.reshape(n, lp8, 8)
    l_out = lp8 - 7                         # floor((L + 64 - 64)/8) + 1
    xcol = jnp.concatenate([xv[:, j:j + l_out, :] for j in range(8)],
                           axis=-1).astype(jnp.bfloat16)

    out = _fused_call(xcol, kp)[:, 0, :]    # (N, 11)
    return out[:, 0:4], out[:, 4:8], out[:, 8:11]


# ----------------------------------------------------------------------------
# Deterministic parameter init (synthetic weights, PyTorch shapes -> matmul layout)
# ----------------------------------------------------------------------------
def init_params(key):
    keys = jax.random.split(key, 26)
    it = iter(keys)

    def rnd(shape, scale=0.1):
        return (scale * jax.random.normal(next(it), shape)).astype(jnp.float32)

    p = {}
    # conv1: torch weight (16, 1, 64) -> (64, 16)
    w = rnd((16, 1, 64))
    p['w1'] = jnp.transpose(w, (2, 1, 0)).reshape(64, 16)
    p['b1'] = rnd((16,)).reshape(1, 16)
    # conv2..conv6: torch (C_out, C_in, 3) -> (3, C_in, C_out)
    for i, (ci, co) in enumerate([(16, 32), (32, 64), (64, 64), (64, 64), (64, 64)],
                                 start=2):
        w = rnd((co, ci, 3))
        p[f'w{i}'] = jnp.transpose(w, (2, 1, 0))
        p[f'b{i}'] = rnd((co,)).reshape(1, co)
    # encoder dense: torch (109, 64) -> (64, 109)
    p['wd'] = rnd((109, 64)).T
    p['bd'] = rnd((109,)).reshape(1, 109)
    # heads: Linear(109,128) + Linear(128, nc)
    for name, nc in [('size', 4), ('type', 4), ('load', 3)]:
        p[f'w_{name}_a'] = rnd((128, 109)).T
        p[f'b_{name}_a'] = rnd((128,)).reshape(1, 128)
        p[f'w_{name}_b'] = rnd((nc, 128)).T
        p[f'b_{name}_b'] = rnd((nc,)).reshape(1, nc)
    return p


# ----------------------------------------------------------------------------
# Pure-JAX f32 reference (same math, no Pallas) for a sanity check
# ----------------------------------------------------------------------------
def reference_forward(x, p):
    n, _, length = x.shape
    xp = jnp.pad(x[:, 0, :], ((0, 0), (32, 32)))
    xv = xp.reshape(n, (length + 64) // 8, 8)
    l_out = xv.shape[1] - 7
    acc = jnp.zeros((n, l_out, 16), jnp.float32) + p['b1'][None]
    for j in range(8):
        acc = acc + jnp.einsum('nls,so->nlo', xv[:, j:j + l_out, :],
                               p['w1'][8 * j:8 * j + 8, :])
    lp = l_out // 2
    a = jnp.maximum(jnp.max(acc[:, :2 * lp].reshape(n, lp, 2, 16), axis=2), 0.0)
    for i in range(2, 7):
        w, b = p[f'w{i}'], p[f'b{i}']
        l_in, c_out = a.shape[1], w.shape[2]
        xpad = jnp.pad(a, ((0, 0), (1, 1), (0, 0)))
        acc = jnp.zeros((n, l_in, c_out), jnp.float32) + b[None]
        for k in range(3):
            acc = acc + jnp.einsum('nlc,co->nlo', xpad[:, k:k + l_in, :], w[k])
        lp = l_in // 2
        a = jnp.maximum(jnp.max(acc[:, :2 * lp].reshape(n, lp, 2, c_out), axis=2), 0.0)
    feat = jnp.mean(a, axis=1)
    enc = feat @ p['wd'] + p['bd']

    def head(wa, ba, wb, bb):
        h = jnp.maximum(enc @ wa + ba, 0.0)
        return h @ wb + bb

    return (head(p['w_size_a'], p['b_size_a'], p['w_size_b'], p['b_size_b']),
            head(p['w_type_a'], p['b_type_a'], p['w_type_b'], p['b_type_b']),
            head(p['w_load_a'], p['b_load_a'], p['w_load_b'], p['b_load_b']))


if __name__ == "__main__":
    key = jax.random.PRNGKey(0)
    kparam, kx = jax.random.split(key)
    params = init_params(kparam)
    # Smallest length valid for this architecture: 6 halvings after a stride-8 conv.
    x = jax.random.normal(kx, (2, 1, 512), dtype=jnp.float32)

    fwd = jax.jit(wdcnnc_forward)
    o1, o2, o3 = fwd(x, params)
    jax.block_until_ready((o1, o2, o3))

    assert o1.shape == (2, 4) and o2.shape == (2, 4) and o3.shape == (2, 3)
    r1, r2, r3 = reference_forward(x, params)
    for o, r in ((o1, r1), (o2, r2), (o3, r3)):
        assert bool(jnp.allclose(o, r, atol=5e-2, rtol=5e-2)), \
            float(jnp.max(jnp.abs(o - r)))
    print("KERNEL_OK")
</pallas_src>

<mosaic_0001>
module attributes {stable_mosaic.version = 11 : i64} {
  func.func @_fused_kernel(%arg0: i32, %arg1: memref<1x65x64xbf16, #tpu.memory_space<vmem>>, %arg2: memref<64x16xbf16, #tpu.memory_space<vmem>>, %arg3: memref<1x16xf32, #tpu.memory_space<vmem>>, %arg4: memref<48x32xbf16, #tpu.memory_space<vmem>>, %arg5: memref<1x32xf32, #tpu.memory_space<vmem>>, %arg6: memref<96x64xbf16, #tpu.memory_space<vmem>>, %arg7: memref<1x64xf32, #tpu.memory_space<vmem>>, %arg8: memref<192x64xbf16, #tpu.memory_space<vmem>>, %arg9: memref<1x64xf32, #tpu.memory_space<vmem>>, %arg10: memref<192x64xbf16, #tpu.memory_space<vmem>>, %arg11: memref<1x64xf32, #tpu.memory_space<vmem>>, %arg12: memref<192x64xbf16, #tpu.memory_space<vmem>>, %arg13: memref<1x64xf32, #tpu.memory_space<vmem>>, %arg14: memref<64x109xbf16, #tpu.memory_space<vmem>>, %arg15: memref<1x109xf32, #tpu.memory_space<vmem>>, %arg16: memref<109x384xbf16, #tpu.memory_space<vmem>>, %arg17: memref<1x384xf32, #tpu.memory_space<vmem>>, %arg18: memref<384x11xbf16, #tpu.memory_space<vmem>>, %arg19: memref<1x11xf32, #tpu.memory_space<vmem>>, %arg20: memref<1x1x11xf32, #tpu.memory_space<vmem>>) attributes {dimension_semantics = [#tpu.dimension_semantics<parallel>], iteration_bounds = array<i64: 2>, scalar_prefetch = 0 : i64, scratch_operands = 0 : i64, tpu.core_type = #tpu.core_type<tc>, window_params = [{transform_indices = @transform_0, window_bounds = array<i64: 1, 65, 64>}, {pipeline_mode = #tpu.pipeline_mode<synchronous>, transform_indices = @transform_1, window_bounds = array<i64: 64, 16>}, {pipeline_mode = #tpu.pipeline_mode<synchronous>, transform_indices = @transform_2, window_bounds = array<i64: 1, 16>}, {pipeline_mode = #tpu.pipeline_mode<synchronous>, transform_indices = @transform_3, window_bounds = array<i64: 48, 32>}, {pipeline_mode = #tpu.pipeline_mode<synchronous>, transform_indices = @transform_4, window_bounds = array<i64: 1, 32>}, {pipeline_mode = #tpu.pipeline_mode<synchronous>, transform_indices = @transform_5, window_bounds = array<i64: 96, 64>}, {pipeline_mode = #tpu.pipeline_mode<synchronous>, transform_indices = @transform_6, window_bounds = array<i64: 1, 64>}, {pipeline_mode = #tpu.pipeline_mode<synchronous>, transform_indices = @transform_7, window_bounds = array<i64: 192, 64>}, {pipeline_mode = #tpu.pipeline_mode<synchronous>, transform_indices = @transform_8, window_bounds = array<i64: 1, 64>}, {pipeline_mode = #tpu.pipeline_mode<synchronous>, transform_indices = @transform_9, window_bounds = array<i64: 192, 64>}, {pipeline_mode = #tpu.pipeline_mode<synchronous>, transform_indices = @transform_10, window_bounds = array<i64: 1, 64>}, {pipeline_mode = #tpu.pipeline_mode<synchronous>, transform_indices = @transform_11, window_bounds = array<i64: 192, 64>}, {pipeline_mode = #tpu.pipeline_mode<synchronous>, transform_indices = @transform_12, window_bounds = array<i64: 1, 64>}, {pipeline_mode = #tpu.pipeline_mode<synchronous>, transform_indices = @transform_13, window_bounds = array<i64: 64, 109>}, {pipeline_mode = #tpu.pipeline_mode<synchronous>, transform_indices = @transform_14, window_bounds = array<i64: 1, 109>}, {pipeline_mode = #tpu.pipeline_mode<synchronous>, transform_indices = @transform_15, window_bounds = array<i64: 109, 384>}, {pipeline_mode = #tpu.pipeline_mode<synchronous>, transform_indices = @transform_16, window_bounds = array<i64: 1, 384>}, {pipeline_mode = #tpu.pipeline_mode<synchronous>, transform_indices = @transform_17, window_bounds = array<i64: 384, 11>}, {pipeline_mode = #tpu.pipeline_mode<synchronous>, transform_indices = @transform_18, window_bounds = array<i64: 1, 11>}, {transform_indices = @transform_19, window_bounds = array<i64: 1, 1, 11>}]} {
    %c0 = arith.constant 0 : index
    %c0_0 = arith.constant 0 : index
    %c0_1 = arith.constant 0 : index
    %0 = vector.load %arg1[%c0, %c0_0, %c0_1] : memref<1x65x64xbf16, #tpu.memory_space<vmem>>, vector<1x65x64xbf16>
    %1 = vector.shape_cast %0 : vector<1x65x64xbf16> to vector<65x64xbf16>
    %c0_2 = arith.constant 0 : index
    %c0_3 = arith.constant 0 : index
    %2 = vector.load %arg2[%c0_2, %c0_3] : memref<64x16xbf16, #tpu.memory_space<vmem>>, vector<64x16xbf16>
    %cst = arith.constant dense<0.000000e+00> : vector<65x16xf32>
    %3 = tpu.matmul %1, %2, %cst {dimension_numbers = #tpu.dot_dimension_numbers<[1], [0], [0], [1], [0, 0, 1, 1], [], []>} : vector<65x64xbf16>, vector<64x16xbf16>, vector<65x16xf32> -> vector<65x16xf32>
    %c0_4 = arith.constant 0 : index
    %c0_5 = arith.constant 0 : index
    %4 = vector.load %arg3[%c0_4, %c0_5] : memref<1x16xf32, #tpu.memory_space<vmem>>, vector<1x16xf32>
    %5 = vector.broadcast %4 : vector<1x16xf32> to vector<65x16xf32>
    %6 = arith.addf %3, %5 : vector<65x16xf32>
    %7 = vector.extract_strided_slice %6 {offsets = [0, 0], sizes = [64, 16], strides = [1, 1]} : vector<65x16xf32> to vector<64x16xf32>
    %8 = vector.shape_cast %7 : vector<64x16xf32> to vector<32x2x16xf32>
    %9 = vector.extract_strided_slice %8 {offsets = [0, 0, 0], sizes = [32, 1, 16], strides = [1, 1, 1]} : vector<32x2x16xf32> to vector<32x1x16xf32>
    %10 = vector.shape_cast %9 : vector<32x1x16xf32> to vector<32x16xf32>
    %11 = vector.extract_strided_slice %8 {offsets = [0, 1, 0], sizes = [32, 1, 16], strides = [1, 1, 1]} : vector<32x2x16xf32> to vector<32x1x16xf32>
    %12 = vector.shape_cast %11 : vector<32x1x16xf32> to vector<32x16xf32>
    %13 = arith.maximumf %10, %12 : vector<32x16xf32>
    %cst_6 = arith.constant 0.000000e+00 : f32
    %14 = vector.broadcast %cst_6 : f32 to vector<32x16xf32>
    %15 = arith.maximumf %13, %14 : vector<32x16xf32>
    %cst_7 = arith.constant 0.000000e+00 : f32
    %16 = vector.broadcast %cst_7 : f32 to vector<1x16xf32>
    %17 = tpu.concatenate %16, %15, %16 in 0 : vector<1x16xf32>, vector<32x16xf32>, vector<1x16xf32> -> vector<34x16xf32>
    %18 = vector.extract_strided_slice %17 {offsets = [0, 0], sizes = [32, 16], strides = [1, 1]} : vector<34x16xf32> to vector<32x16xf32>
    %19 = vector.extract_strided_slice %17 {offsets = [1, 0], sizes = [32, 16], strides = [1, 1]} : vector<34x16xf32> to vector<32x16xf32>
    %20 = vector.extract_strided_slice %17 {offsets = [2, 0], sizes = [32, 16], strides = [1, 1]} : vector<34x16xf32> to vector<32x16xf32>
    %21 = tpu.concatenate %18, %19, %20 in 1 : vector<32x16xf32>, vector<32x16xf32>, vector<32x16xf32> -> vector<32x48xf32>
    %22 = arith.truncf %21 : vector<32x48xf32> to vector<32x48xbf16>
    %c0_8 = arith.constant 0 : index
    %c0_9 = arith.constant 0 : index
    %23 = vector.load %arg4[%c0_8, %c0_9] : memref<48x32xbf16, #tpu.memory_space<vmem>>, vector<48x32xbf16>
    %cst_10 = arith.constant dense<0.000000e+00> : vector<32x32xf32>
    %24 = tpu.matmul %22, %23, %cst_10 {dimension_numbers = #tpu.dot_dimension_numbers<[1], [0], [0], [1], [0, 0, 1, 1], [], []>} : vector<32x48xbf16>, vector<48x32xbf16>, vector<32x32xf32> -> vector<32x32xf32>
    %c0_11 = arith.constant 0 : index
    %c0_12 = arith.constant 0 : index
    %25 = vector.load %arg5[%c0_11, %c0_12] : memref<1x32xf32, #tpu.memory_space<vmem>>, vector<1x32xf32>
    %26 = vector.broadcast %25 : vector<1x32xf32> to vector<32x32xf32>
    %27 = arith.addf %24, %26 : vector<32x32xf32>
    %28 = vector.shape_cast %27 : vector<32x32xf32> to vector<16x2x32xf32>
    %29 = vector.extract_strided_slice %28 {offsets = [0, 0, 0], sizes = [16, 1, 32], strides = [1, 1, 1]} : vector<16x2x32xf32> to vector<16x1x32xf32>
    %30 = vector.shape_cast %29 : vector<16x1x32xf32> to vector<16x32xf32>
    %31 = vector.extract_strided_slice %28 {offsets = [0, 1, 0], sizes = [16, 1, 32], strides = [1, 1, 1]} : vector<16x2x32xf32> to vector<16x1x32xf32>
    %32 = vector.shape_cast %31 : vector<16x1x32xf32> to vector<16x32xf32>
    %33 = arith.maximumf %30, %32 : vector<16x32xf32>
    %cst_13 = arith.constant 0.000000e+00 : f32
    %34 = vector.broadcast %cst_13 : f32 to vector<16x32xf32>
    %35 = arith.maximumf %33, %34 : vector<16x32xf32>
    %cst_14 = arith.constant 0.000000e+00 : f32
    %36 = vector.broadcast %cst_14 : f32 to vector<1x32xf32>
    %37 = tpu.concatenate %36, %35, %36 in 0 : vector<1x32xf32>, vector<16x32xf32>, vector<1x32xf32> -> vector<18x32xf32>
    %38 = vector.extract_strided_slice %37 {offsets = [0, 0], sizes = [16, 32], strides = [1, 1]} : vector<18x32xf32> to vector<16x32xf32>
    %39 = vector.extract_strided_slice %37 {offsets = [1, 0], sizes = [16, 32], strides = [1, 1]} : vector<18x32xf32> to vector<16x32xf32>
    %40 = vector.extract_strided_slice %37 {offsets = [2, 0], sizes = [16, 32], strides = [1, 1]} : vector<18x32xf32> to vector<16x32xf32>
    %41 = tpu.concatenate %38, %39, %40 in 1 : vector<16x32xf32>, vector<16x32xf32>, vector<16x32xf32> -> vector<16x96xf32>
    %42 = arith.truncf %41 : vector<16x96xf32> to vector<16x96xbf16>
    %c0_15 = arith.constant 0 : index
    %c0_16 = arith.constant 0 : index
    %43 = vector.load %arg6[%c0_15, %c0_16] : memref<96x64xbf16, #tpu.memory_space<vmem>>, vector<96x64xbf16>
    %cst_17 = arith.constant dense<0.000000e+00> : vector<16x64xf32>
    %44 = tpu.matmul %42, %43, %cst_17 {dimension_numbers = #tpu.dot_dimension_numbers<[1], [0], [0], [1], [0, 0, 1, 1], [], []>} : vector<16x96xbf16>, vector<96x64xbf16>, vector<16x64xf32> -> vector<16x64xf32>
    %c0_18 = arith.constant 0 : index
    %c0_19 = arith.constant 0 : index
    %45 = vector.load %arg7[%c0_18, %c0_19] : memref<1x64xf32, #tpu.memory_space<vmem>>, vector<1x64xf32>
    %46 = vector.broadcast %45 : vector<1x64xf32> to vector<16x64xf32>
    %47 = arith.addf %44, %46 : vector<16x64xf32>
    %48 = vector.shape_cast %47 : vector<16x64xf32> to vector<8x2x64xf32>
    %49 = vector.extract_strided_slice %48 {offsets = [0, 0, 0], sizes = [8, 1, 64], strides = [1, 1, 1]} : vector<8x2x64xf32> to vector<8x1x64xf32>
    %50 = vector.shape_cast %49 : vector<8x1x64xf32> to vector<8x64xf32>
    %51 = vector.extract_strided_slice %48 {offsets = [0, 1, 0], sizes = [8, 1, 64], strides = [1, 1, 1]} : vector<8x2x64xf32> to vector<8x1x64xf32>
    %52 = vector.shape_cast %51 : vector<8x1x64xf32> to vector<8x64xf32>
    %53 = arith.maximumf %50, %52 : vector<8x64xf32>
    %cst_20 = arith.constant 0.000000e+00 : f32
    %54 = vector.broadcast %cst_20 : f32 to vector<8x64xf32>
    %55 = arith.maximumf %53, %54 : vector<8x64xf32>
    %cst_21 = arith.constant 0.000000e+00 : f32
    %56 = vector.broadcast %cst_21 : f32 to vector<1x64xf32>
    %57 = tpu.concatenate %56, %55, %56 in 0 : vector<1x64xf32>, vector<8x64xf32>, vector<1x64xf32> -> vector<10x64xf32>
    %58 = vector.extract_strided_slice %57 {offsets = [0, 0], sizes = [8, 64], strides = [1, 1]} : vector<10x64xf32> to vector<8x64xf32>
    %59 = vector.extract_strided_slice %57 {offsets = [1, 0], sizes = [8, 64], strides = [1, 1]} : vector<10x64xf32> to vector<8x64xf32>
    %60 = vector.extract_strided_slice %57 {offsets = [2, 0], sizes = [8, 64], strides = [1, 1]} : vector<10x64xf32> to vector<8x64xf32>
    %61 = tpu.concatenate %58, %59, %60 in 1 : vector<8x64xf32>, vector<8x64xf32>, vector<8x64xf32> -> vector<8x192xf32>
    %62 = arith.truncf %61 : vector<8x192xf32> to vector<8x192xbf16>
    %c0_22 = arith.constant 0 : index
    %c0_23 = arith.constant 0 : index
    %63 = vector.load %arg8[%c0_22, %c0_23] : memref<192x64xbf16, #tpu.memory_space<vmem>>, vector<192x64xbf16>
    %cst_24 = arith.constant dense<0.000000e+00> : vector<8x64xf32>
    %64 = tpu.matmul %62, %63, %cst_24 {dimension_numbers = #tpu.dot_dimension_numbers<[1], [0], [0], [1], [0, 0, 1, 1], [], []>} : vector<8x192xbf16>, vector<192x64xbf16>, vector<8x64xf32> -> vector<8x64xf32>
    %c0_25 = arith.constant 0 : index
    %c0_26 = arith.constant 0 : index
    %65 = vector.load %arg9[%c0_25, %c0_26] : memref<1x64xf32, #tpu.memory_space<vmem>>, vector<1x64xf32>
    %66 = vector.broadcast %65 : vector<1x64xf32> to vector<8x64xf32>
    %67 = arith.addf %64, %66 : vector<8x64xf32>
    %68 = vector.shape_cast %67 : vector<8x64xf32> to vector<4x2x64xf32>
    %69 = vector.extract_strided_slice %68 {offsets = [0, 0, 0], sizes = [4, 1, 64], strides = [1, 1, 1]} : vector<4x2x64xf32> to vector<4x1x64xf32>
    %70 = vector.shape_cast %69 : vector<4x1x64xf32> to vector<4x64xf32>
    %71 = vector.extract_strided_slice %68 {offsets = [0, 1, 0], sizes = [4, 1, 64], strides = [1, 1, 1]} : vector<4x2x64xf32> to vector<4x1x64xf32>
    %72 = vector.shape_cast %71 : vector<4x1x64xf32> to vector<4x64xf32>
    %73 = arith.maximumf %70, %72 : vector<4x64xf32>
    %cst_27 = arith.constant 0.000000e+00 : f32
    %74 = vector.broadcast %cst_27 : f32 to vector<4x64xf32>
    %75 = arith.maximumf %73, %74 : vector<4x64xf32>
    %cst_28 = arith.constant 0.000000e+00 : f32
    %76 = vector.broadcast %cst_28 : f32 to vector<1x64xf32>
    %77 = tpu.concatenate %76, %75, %76 in 0 : vector<1x64xf32>, vector<4x64xf32>, vector<1x64xf32> -> vector<6x64xf32>
    %78 = vector.extract_strided_slice %77 {offsets = [0, 0], sizes = [4, 64], strides = [1, 1]} : vector<6x64xf32> to vector<4x64xf32>
    %79 = vector.extract_strided_slice %77 {offsets = [1, 0], sizes = [4, 64], strides = [1, 1]} : vector<6x64xf32> to vector<4x64xf32>
    %80 = vector.extract_strided_slice %77 {offsets = [2, 0], sizes = [4, 64], strides = [1, 1]} : vector<6x64xf32> to vector<4x64xf32>
    %81 = tpu.concatenate %78, %79, %80 in 1 : vector<4x64xf32>, vector<4x64xf32>, vector<4x64xf32> -> vector<4x192xf32>
    %82 = arith.truncf %81 : vector<4x192xf32> to vector<4x192xbf16>
    %c0_29 = arith.constant 0 : index
    %c0_30 = arith.constant 0 : index
    %83 = vector.load %arg10[%c0_29, %c0_30] : memref<192x64xbf16, #tpu.memory_space<vmem>>, vector<192x64xbf16>
    %cst_31 = arith.constant dense<0.000000e+00> : vector<4x64xf32>
    %84 = tpu.matmul %82, %83, %cst_31 {dimension_numbers = #tpu.dot_dimension_numbers<[1], [0], [0], [1], [0, 0, 1, 1], [], []>} : vector<4x192xbf16>, vector<192x64xbf16>, vector<4x64xf32> -> vector<4x64xf32>
    %c0_32 = arith.constant 0 : index
    %c0_33 = arith.constant 0 : index
    %85 = vector.load %arg11[%c0_32, %c0_33] : memref<1x64xf32, #tpu.memory_space<vmem>>, vector<1x64xf32>
    %86 = vector.broadcast %85 : vector<1x64xf32> to vector<4x64xf32>
    %87 = arith.addf %84, %86 : vector<4x64xf32>
    %88 = vector.shape_cast %87 : vector<4x64xf32> to vector<2x2x64xf32>
    %89 = vector.extract_strided_slice %88 {offsets = [0, 0, 0], sizes = [2, 1, 64], strides = [1, 1, 1]} : vector<2x2x64xf32> to vector<2x1x64xf32>
    %90 = vector.shape_cast %89 : vector<2x1x64xf32> to vector<2x64xf32>
    %91 = vector.extract_strided_slice %88 {offsets = [0, 1, 0], sizes = [2, 1, 64], strides = [1, 1, 1]} : vector<2x2x64xf32> to vector<2x1x64xf32>
    %92 = vector.shape_cast %91 : vector<2x1x64xf32> to vector<2x64xf32>
    %93 = arith.maximumf %90, %92 : vector<2x64xf32>
    %cst_34 = arith.constant 0.000000e+00 : f32
    %94 = vector.broadcast %cst_34 : f32 to vector<2x64xf32>
    %95 = arith.maximumf %93, %94 : vector<2x64xf32>
    %cst_35 = arith.constant 0.000000e+00 : f32
    %96 = vector.broadcast %cst_35 : f32 to vector<1x64xf32>
    %97 = tpu.concatenate %96, %95, %96 in 0 : vector<1x64xf32>, vector<2x64xf32>, vector<1x64xf32> -> vector<4x64xf32>
    %98 = vector.extract_strided_slice %97 {offsets = [0, 0], sizes = [2, 64], strides = [1, 1]} : vector<4x64xf32> to vector<2x64xf32>
    %99 = vector.extract_strided_slice %97 {offsets = [1, 0], sizes = [2, 64], strides = [1, 1]} : vector<4x64xf32> to vector<2x64xf32>
    %100 = vector.extract_strided_slice %97 {offsets = [2, 0], sizes = [2, 64], strides = [1, 1]} : vector<4x64xf32> to vector<2x64xf32>
    %101 = tpu.concatenate %98, %99, %100 in 1 : vector<2x64xf32>, vector<2x64xf32>, vector<2x64xf32> -> vector<2x192xf32>
    %102 = arith.truncf %101 : vector<2x192xf32> to vector<2x192xbf16>
    %c0_36 = arith.constant 0 : index
    %c0_37 = arith.constant 0 : index
    %103 = vector.load %arg12[%c0_36, %c0_37] : memref<192x64xbf16, #tpu.memory_space<vmem>>, vector<192x64xbf16>
    %cst_38 = arith.constant dense<0.000000e+00> : vector<2x64xf32>
    %104 = tpu.matmul %102, %103, %cst_38 {dimension_numbers = #tpu.dot_dimension_numbers<[1], [0], [0], [1], [0, 0, 1, 1], [], []>} : vector<2x192xbf16>, vector<192x64xbf16>, vector<2x64xf32> -> vector<2x64xf32>
    %c0_39 = arith.constant 0 : index
    %c0_40 = arith.constant 0 : index
    %105 = vector.load %arg13[%c0_39, %c0_40] : memref<1x64xf32, #tpu.memory_space<vmem>>, vector<1x64xf32>
    %106 = vector.broadcast %105 : vector<1x64xf32> to vector<2x64xf32>
    %107 = arith.addf %104, %106 : vector<2x64xf32>
    %108 = vector.shape_cast %107 : vector<2x64xf32> to vector<1x2x64xf32>
    %109 = vector.extract_strided_slice %108 {offsets = [0, 0, 0], sizes = [1, 1, 64], strides = [1, 1, 1]} : vector<1x2x64xf32> to vector<1x1x64xf32>
    %110 = vector.shape_cast %109 : vector<1x1x64xf32> to vector<1x64xf32>
    %111 = vector.extract_strided_slice %108 {offsets = [0, 1, 0], sizes = [1, 1, 64], strides = [1, 1, 1]} : vector<1x2x64xf32> to vector<1x1x64xf32>
    %112 = vector.shape_cast %111 : vector<1x1x64xf32> to vector<1x64xf32>
    %113 = arith.maximumf %110, %112 : vector<1x64xf32>
    %cst_41 = arith.constant 0.000000e+00 : f32
    %114 = vector.broadcast %cst_41 : f32 to vector<1x64xf32>
    %115 = arith.maximumf %113, %114 : vector<1x64xf32>
    %cst_42 = arith.constant dense<0.000000e+00> : vector<64xf32>
    %116 = vector.multi_reduction <add>, %115, %cst_42 [0] : vector<1x64xf32> to vector<64xf32>
    %117 = vector.shape_cast %116 : vector<64xf32> to vector<1x64xf32>
    %cst_43 = arith.constant 1.000000e+00 : f32
    %118 = vector.broadcast %cst_43 : f32 to vector<1x64xf32>
    %119 = arith.divf %117, %118 : vector<1x64xf32>
    %120 = arith.truncf %119 : vector<1x64xf32> to vector<1x64xbf16>
    %c0_44 = arith.constant 0 : index
    %c0_45 = arith.constant 0 : index
    %121 = vector.load %arg14[%c0_44, %c0_45] : memref<64x109xbf16, #tpu.memory_space<vmem>>, vector<64x109xbf16>
    %cst_46 = arith.constant dense<0.000000e+00> : vector<1x109xf32>
    %122 = tpu.matmul %120, %121, %cst_46 {dimension_numbers = #tpu.dot_dimension_numbers<[1], [0], [0], [1], [0, 0, 1, 1], [], []>} : vector<1x64xbf16>, vector<64x109xbf16>, vector<1x109xf32> -> vector<1x109xf32>
    %c0_47 = arith.constant 0 : index
    %c0_48 = arith.constant 0 : index
    %123 = vector.load %arg15[%c0_47, %c0_48] : memref<1x109xf32, #tpu.memory_space<vmem>>, vector<1x109xf32>
    %124 = arith.addf %122, %123 : vector<1x109xf32>
    %125 = arith.truncf %124 : vector<1x109xf32> to vector<1x109xbf16>
    %c0_49 = arith.constant 0 : index
    %c0_50 = arith.constant 0 : index
    %126 = vector.load %arg16[%c0_49, %c0_50] : memref<109x384xbf16, #tpu.memory_space<vmem>>, vector<109x384xbf16>
    %cst_51 = arith.constant dense<0.000000e+00> : vector<1x384xf32>
    %127 = tpu.matmul %125, %126, %cst_51 {dimension_numbers = #tpu.dot_dimension_numbers<[1], [0], [0], [1], [0, 0, 1, 1], [], []>} : vector<1x109xbf16>, vector<109x384xbf16>, vector<1x384xf32> -> vector<1x384xf32>
    %c0_52 = arith.constant 0 : index
    %c0_53 = arith.constant 0 : index
    %128 = vector.load %arg17[%c0_52, %c0_53] : memref<1x384xf32, #tpu.memory_space<vmem>>, vector<1x384xf32>
    %129 = arith.addf %127, %128 : vector<1x384xf32>
    %cst_54 = arith.constant 0.000000e+00 : f32
    %130 = vector.broadcast %cst_54 : f32 to vector<1x384xf32>
    %131 = arith.maximumf %129, %130 : vector<1x384xf32>
    %132 = arith.truncf %131 : vector<1x384xf32> to vector<1x384xbf16>
    %c0_55 = arith.constant 0 : index
    %c0_56 = arith.constant 0 : index
    %133 = vector.load %arg18[%c0_55, %c0_56] : memref<384x11xbf16, #tpu.memory_space<vmem>>, vector<384x11xbf16>
    %cst_57 = arith.constant dense<0.000000e+00> : vector<1x11xf32>
    %134 = tpu.matmul %132, %133, %cst_57 {dimension_numbers = #tpu.dot_dimension_numbers<[1], [0], [0], [1], [0, 0, 1, 1], [], []>} : vector<1x384xbf16>, vector<384x11xbf16>, vector<1x11xf32> -> vector<1x11xf32>
    %c0_58 = arith.constant 0 : index
    %c0_59 = arith.constant 0 : index
    %135 = vector.load %arg19[%c0_58, %c0_59] : memref<1x11xf32, #tpu.memory_space<vmem>>, vector<1x11xf32>
    %136 = arith.addf %134, %135 : vector<1x11xf32>
    %c0_60 = arith.constant 0 : index
    %c0_61 = arith.constant 0 : index
    %c0_62 = arith.constant 0 : index
    %137 = vector.load %arg20[%c0_60, %c0_61, %c0_62] : memref<1x1x11xf32, #tpu.memory_space<vmem>>, vector<1x1x11xf32>
    %138 = vector.shape_cast %137 : vector<1x1x11xf32> to vector<1x11xf32>
    %139 = vector.shape_cast %136 : vector<1x11xf32> to vector<1x1x11xf32>
    tpu.vector_store %arg20[%c0_60, %c0_61, %c0_62], %139 {strides = array<i32>} : memref<1x1x11xf32, #tpu.memory_space<vmem>>, vector<1x1x11xf32>,
    return
  }
  func.func @transform_0(%arg0: i32) -> (i32, i32, i32) {
    %c0_i32 = arith.constant 0 : i32
    %c0_i32_0 = arith.constant 0 : i32
    %c0_i32_1 = arith.constant 0 : i32
    return %arg0, %c0_i32, %c0_i32_0 : i32, i32, i32
  }
  func.func @transform_1(%arg0: i32) -> (i32, i32) {
    %c0_i32 = arith.constant 0 : i32
    %c0_i32_0 = arith.constant 0 : i32
    %c0_i32_1 = arith.constant 0 : i32
    return %c0_i32, %c0_i32_0 : i32, i32
  }
  func.func @transform_2(%arg0: i32) -> (i32, i32) {
    %c0_i32 = arith.constant 0 : i32
    %c0_i32_0 = arith.constant 0 : i32
    %c0_i32_1 = arith.constant 0 : i32
    return %c0_i32, %c0_i32_0 : i32, i32
  }
  func.func @transform_3(%arg0: i32) -> (i32, i32) {
    %c0_i32 = arith.constant 0 : i32
    %c0_i32_0 = arith.constant 0 : i32
    %c0_i32_1 = arith.constant 0 : i32
    return %c0_i32, %c0_i32_0 : i32, i32
  }
  func.func @transform_4(%arg0: i32) -> (i32, i32) {
    %c0_i32 = arith.constant 0 : i32
    %c0_i32_0 = arith.constant 0 : i32
    %c0_i32_1 = arith.constant 0 : i32
    return %c0_i32, %c0_i32_0 : i32, i32
  }
  func.func @transform_5(%arg0: i32) -> (i32, i32) {
    %c0_i32 = arith.constant 0 : i32
    %c0_i32_0 = arith.constant 0 : i32
    %c0_i32_1 = arith.constant 0 : i32
    return %c0_i32, %c0_i32_0 : i32, i32
  }
  func.func @transform_6(%arg0: i32) -> (i32, i32) {
    %c0_i32 = arith.constant 0 : i32
    %c0_i32_0 = arith.constant 0 : i32
    %c0_i32_1 = arith.constant 0 : i32
    return %c0_i32, %c0_i32_0 : i32, i32
  }
  func.func @transform_7(%arg0: i32) -> (i32, i32) {
    %c0_i32 = arith.constant 0 : i32
    %c0_i32_0 = arith.constant 0 : i32
    %c0_i32_1 = arith.constant 0 : i32
    return %c0_i32, %c0_i32_0 : i32, i32
  }
  func.func @transform_8(%arg0: i32) -> (i32, i32) {
    %c0_i32 = arith.constant 0 : i32
    %c0_i32_0 = arith.constant 0 : i32
    %c0_i32_1 = arith.constant 0 : i32
    return %c0_i32, %c0_i32_0 : i32, i32
  }
  func.func @transform_9(%arg0: i32) -> (i32, i32) {
    %c0_i32 = arith.constant 0 : i32
    %c0_i32_0 = arith.constant 0 : i32
    %c0_i32_1 = arith.constant 0 : i32
    return %c0_i32, %c0_i32_0 : i32, i32
  }
  func.func @transform_10(%arg0: i32) -> (i32, i32) {
    %c0_i32 = arith.constant 0 : i32
    %c0_i32_0 = arith.constant 0 : i32
    %c0_i32_1 = arith.constant 0 : i32
    return %c0_i32, %c0_i32_0 : i32, i32
  }
  func.func @transform_11(%arg0: i32) -> (i32, i32) {
    %c0_i32 = arith.constant 0 : i32
    %c0_i32_0 = arith.constant 0 : i32
    %c0_i32_1 = arith.constant 0 : i32
    return %c0_i32, %c0_i32_0 : i32, i32
  }
  func.func @transform_12(%arg0: i32) -> (i32, i32) {
    %c0_i32 = arith.constant 0 : i32
    %c0_i32_0 = arith.constant 0 : i32
    %c0_i32_1 = arith.constant 0 : i32
    return %c0_i32, %c0_i32_0 : i32, i32
  }
  func.func @transform_13(%arg0: i32) -> (i32, i32) {
    %c0_i32 = arith.constant 0 : i32
    %c0_i32_0 = arith.constant 0 : i32
    %c0_i32_1 = arith.constant 0 : i32
    return %c0_i32, %c0_i32_0 : i32, i32
  }
  func.func @transform_14(%arg0: i32) -> (i32, i32) {
    %c0_i32 = arith.constant 0 : i32
    %c0_i32_0 = arith.constant 0 : i32
    %c0_i32_1 = arith.constant 0 : i32
    return %c0_i32, %c0_i32_0 : i32, i32
  }
  func.func @transform_15(%arg0: i32) -> (i32, i32) {
    %c0_i32 = arith.constant 0 : i32
    %c0_i32_0 = arith.constant 0 : i32
    %c0_i32_1 = arith.constant 0 : i32
    return %c0_i32, %c0_i32_0 : i32, i32
  }
  func.func @transform_16(%arg0: i32) -> (i32, i32) {
    %c0_i32 = arith.constant 0 : i32
    %c0_i32_0 = arith.constant 0 : i32
    %c0_i32_1 = arith.constant 0 : i32
    return %c0_i32, %c0_i32_0 : i32, i32
  }
  func.func @transform_17(%arg0: i32) -> (i32, i32) {
    %c0_i32 = arith.constant 0 : i32
    %c0_i32_0 = arith.constant 0 : i32
    %c0_i32_1 = arith.constant 0 : i32
    return %c0_i32, %c0_i32_0 : i32, i32
  }
  func.func @transform_18(%arg0: i32) -> (i32, i32) {
    %c0_i32 = arith.constant 0 : i32
    %c0_i32_0 = arith.constant 0 : i32
    %c0_i32_1 = arith.constant 0 : i32
    return %c0_i32, %c0_i32_0 : i32, i32
  }
  func.func @transform_19(%arg0: i32) -> (i32, i32, i32) {
    %c0_i32 = arith.constant 0 : i32
    %c0_i32_0 = arith.constant 0 : i32
    %c0_i32_1 = arith.constant 0 : i32
    return %arg0, %c0_i32, %c0_i32_0 : i32, i32, i32
  }
}

</mosaic_0001>

<bundles_post_ra>
// kernel: wdcnnc_forward.1
= control target key start
LH: loop header
LB: loop body
LE: loop exit
PB: predicated region body
PF: predicated region fallthrough
CT: control target
= control target key end

     0   :  { %s4539_s0 = inlined_call_operand.vmem [shape: bf16[2,65,64], index: 0, kind: input, shape index: {}]   ;;  %s4540_s1 = inlined_call_operand.vmem [shape: bf16[64,16], index: 1, kind: input, shape index: {}]   ;;  %s4541_s2 = inlined_call_operand.vmem [shape: f32[1,16], index: 2, kind: input, shape index: {}]   ;;  %s4542_s3 = inlined_call_operand.vmem [shape: bf16[48,32], index: 3, kind: input, shape index: {}]   ;;  %s4543_s4 = inlined_call_operand.vmem [shape: f32[1,32], index: 4, kind: input, shape index: {}]   ;;  %s4544_s5 = inlined_call_operand.vmem [shape: bf16[96,64], index: 5, kind: input, shape index: {}]   ;;  %s4545_s6 = inlined_call_operand.vmem [shape: f32[1,64], index: 6, kind: input, shape index: {}]   ;;  %s4546_s7 = inlined_call_operand.vmem [shape: bf16[192,64], index: 7, kind: input, shape index: {}]   ;;  %s4547_s8 = inlined_call_operand.vmem [shape: f32[1,64], index: 8, kind: input, shape index: {}]   ;;  %s4548_s9 = inlined_call_operand.vmem [shape: bf16[192,64], index: 9, kind: input, shape index: {}]   ;;  %s4549_s10 = inlined_call_operand.vmem [shape: f32[1,64], index: 10, kind: input, shape index: {}]   ;;  %s4550_s11 = inlined_call_operand.vmem [shape: bf16[192,64], index: 11, kind: input, shape index: {}]   ;;  %s4551_s12 = inlined_call_operand.vmem [shape: f32[1,64], index: 12, kind: input, shape index: {}]   ;;  %s4552_s13 = inlined_call_operand.vmem [shape: bf16[64,109], index: 13, kind: input, shape index: {}]   ;;  %s4553_s14 = inlined_call_operand.vmem [shape: f32[1,109], index: 14, kind: input, shape index: {}]   ;;  %s4554_s15 = inlined_call_operand.vmem [shape: bf16[109,384], index: 15, kind: input, shape index: {}]   ;;  %s4555_s16 = inlined_call_operand.vmem [shape: f32[1,384], index: 16, kind: input, shape index: {}]   ;;  %s4556_s17 = inlined_call_operand.vmem [shape: bf16[384,11], index: 17, kind: input, shape index: {}]   ;;  %s4557_s18 = inlined_call_operand.vmem [shape: f32[1,11], index: 18, kind: input, shape index: {}]   ;;  %s4558_s19 = inlined_call_operand.vmem [shape: f32[2,1,11], index: 19, kind: output, shape index: {}]  }
   0x1   :  { %4561 = sst [smem:[#allocation2_spill]] %s4539_s0  ;;  %s3845_s0 = smov 0  }
   0x2   :  { %4562 = sst [smem:[#allocation3_spill]] %s4540_s1 }
   0x3   :  { %4563 = sst [smem:[#allocation4_spill]] %s4541_s2 }
   0x4   :  { %4564 = sst [smem:[#allocation5_spill]] %s4542_s3 }
   0x5 LB: > { %s3210_s30 = sadd.s32 4294967295, %s3735_s0   ;;  %p3214_p0 = scmp.ge.s32.totalorder %s3735_s0, 1  ;;  %s3735_s0 = sphi %s3845_s0, %s29_s0  }
   0x6   : > { %p537_p1 = scmp.lt.s32.totalorder %s3735_s0, 3 }
   0x8   : > { %p538_p2 = pnand %p3214_p0, %p537_p1 }
   0x9   : > { %s4565_s1 = sld [smem:[#allocation3_spill]] (!%p538_p2)  ;;  %p591_p3 = scmp.lt.s32.totalorder (!%p538_p2), %s3210_s30, 1 }
   0xa   : > { %541 = sbr.rel (%p538_p2) target bundleno = 2566 (0xa06), region = 96  ;;  %s4566_s27 = sld [smem:[#allocation2_spill]] (!%p538_p2) }
   0xb   : > { %s4567_s2 = sld [smem:[#allocation4_spill]] (!%p538_p2)  ;;  %s3740_s20 = smov (!%p538_p2), 32  }
   0xc   : > { %s3741_s21 = smov (!%p538_p2), 16   ;;  %s3742_s26 = smov (!%p538_p2), 64  }
   0xf   : > { %v3619_v0 = vld [vmem:[%s4565_s1 + $0x18] sm:$0xff]   ;;  %v3737_v1 = vmov 0.0   ;;  %v3620_v2 = vld [vmem:[%s4565_s1 + $0x10] sm:$0xff]   ;;  %vm3738_vm0 = vmmov 0   ;;  %v3621_v3 = vld [vmem:[%s4565_s1 + $0x8] sm:$0xff]   ;;  %s4570_s30 = smov (!%p591_p3, %s3210_s30), 1  ;;  %v770_v11 = vlaneseq }
  0x10   : > { %3468 = vmatprep.subr.bf16.mxu0 %v3737_v1  ;;  %3476 = vmatprep.mubr.msk.bf16.mxu0 %vm3738_vm0, %v3737_v1  ;;  %s3572_s25 = smul.u32 36, %s4570_s30  ;;  %v3622_v4 = vld [vmem:[%s4565_s1] sm:$0xff]   ;;  %vm671_vm1 = vcmask 523264   ;;  %v3739_v9 = vmov 1983009808   ;;  %vm1254_vm2 = vcmask 1042434  }
  0x11   : > { %3469 = vmatpush3.bf16.msra.mxu0 %v3619_v0  ;;  %v768_v10 = vunpack.c.l.s4 %v3739_v9  ;;  %v3895_v13 = vshrl.u32 %v770_v11, 7  ;;  %v3900_v14 = vld [vmem:[%s4567_s2] ss:$0 sm:$0xff]  ;;  %vm1256_vm3 = vcmask 1043459   ;;  %vm1258_vm4 = vcmask 1044484   ;;  %s598_s2 = scalar_lea.vmem %s4558_s19, %s4570_s30 }
  0x12   : > { %3470 = vmatprep.subr.bf16.mxu0 %v3737_v1  ;;  %s3873_s28 = scalar_lea.vmem %s4566_s27, %s3572_s25  ;;  %vm1260_vm5 = vcmask 1045509   ;;  %vm1266_vm6 = vcmask 1041409   ;;  %vm1262_vm7 = vcmask 1046534   ;;  %vm1264_vm8 = vcmask 1047559   ;;  %s4568_s25 = sld [smem:[#allocation5_spill]] }
  0x13   : > { %v3623_v5 = vld [vmem:[%s3873_s28] sm:$0xff]   ;;  %v3624_v6 = vld [vmem:[%s3873_s28 + $0x8] sm:$0xff]   ;;  %v3625_v7 = vld [vmem:[%s3873_s28 + $0x10] sm:$0xff]   ;;  %v769_v12 = vunpack.c.0.s8 %v768_v10  ;;  %v3910_v26 = vsub.s32 0, %v3895_v13  ;;  %vm1293_vm9 = vcmask 1040384   ;;  %vm1320_vm10 = vcmask 1045504  }
  0x14   : > { %v3626_v8 = vld [vmem:[%s3873_s28 + $0x18] sm:$0xff]   ;;  %vm1298_vm11 = vcmask 1046528   ;;  %vm1342_vm12 = vcmask 130048   ;;  %vm1347_vm13 = vcmask 261120   ;;  %vm1385_vm14 = vcmask 392192  }
  0x15   : > { %3471 = vmatpush3.bf16.msra.mxu0 %v3620_v2  ;;  %v3903_v15 = vsub.s32 %v769_v12, %v3895_v13  ;;  %vm1791_vm15 = vcmask 785408  }
  0x16   : > { %3472 = vmatprep.subr.bf16.mxu0 %v3737_v1 }
  0x19   : > { %3473 = vmatpush3.bf16.msra.mxu0 %v3621_v3 }
  0x1a   : > { %3474 = vmatprep.subr.bf16.mxu0 %v3737_v1 }
  0x1d   : > { %3475 = vmatpush3.bf16.msra.mxu0 %v3622_v4 }
  0x20   : > { %3477 = vmatmul.mubr.msk.bf16.vlgmr.msra.gmra.mxu0 %vm671_vm1, %v3623_v5 }
  0x21   : > { %3480 = vmatprep.mubr.msk.bf16.mxu0 %vm3738_vm0, %v3737_v1 }
  0x28   : > { %3481 = vmatmul.mubr.msk.bf16.gmra.mxu0 %vm671_vm1, %v3624_v6 }
  0x29   : > { %3484 = vmatprep.mubr.msk.bf16.mxu0 %vm3738_vm0, %v3737_v1 }
  0x30   : > { %3485 = vmatmul.mubr.msk.bf16.gmra.mxu0 %vm671_vm1, %v3625_v7 }
  0x31   : > { %3488 = vmatprep.mubr.msk.bf16.mxu0 %vm3738_vm0, %v3737_v1 }
  0x38   : > { %3489 = vmatmul.mubr.msk.bf16.gmra.mxu0 %vm671_vm1, %v3626_v8 }
  0x39   : > { %3492 = vmatprep.mubr.msk.bf16.mxu0 %vm3738_vm0, %v3737_v1 }
  0xe0   : > { %v721_v16 = vpop.f32.mrf.mxu0 }
  0xe1   : > { %v722_v17 = vadd.f32 %v3900_v14, %v721_v16 }
  0xe2   : > { %v3478_v18 = vpop.f32.mrf.mxu0 }
  0xe3   : > { %v766_v19 = vcombine.high %v722_v17, %v722_v17  ;;  %v773_v20 = vrot.slane %v722_v17, %v3903_v15 }
  0xe4   : > { %v724_v21 = vpop.f32.mrf.mxu0 }
  0xe5   : > { %v780_v22 = vrot.slane %v766_v19, %v3903_v15  ;;  %v781_v23 = vcombine.high %v773_v20, %v773_v20  ;;  %v3231_v24 = vrot.slane %v773_v20, 9  ;;  %v725_v25 = vadd.f32 %v3900_v14, %v724_v21 }
  0xe6   : > { %v3479_v27 = vpop.f32.mrf.mxu0 }
  0xe7   : > { %v782_v28 = vcombine.high %v780_v22, %v780_v22  ;;  %v3232_v29 = vrot.slane %v781_v23, 9  ;;  %v3233_v30 = vrot.slane %v780_v22, 9  ;;  %v1030_v31 = vmax.f32 %v773_v20, %v3231_v24 }
  0xe8   : > { %v783_v32 = vcombine.high %v725_v25, %v725_v25  ;;  %v790_v33 = vrot.slane %v725_v25, %v3903_v15  ;;  %v729_v34 = vpop.f32.mrf.mxu0 }
  0xe9   : > { %v3234_v35 = vrot.slane %v782_v28, 9  ;;  %v1031_v36 = vmax.f32 %v781_v23, %v3232_v29  ;;  %v1032_v37 = vmax.f32 %v780_v22, %v3233_v30  ;;  %v1062_v38 = vmax.f32 %v1030_v31, 0.0 }
  0xea   : > { %v797_v39 = vrot.slane %v783_v32, %v3903_v15  ;;  %v798_v40 = vcombine.high %v790_v33, %v790_v33  ;;  %v3235_v41 = vrot.slane %v790_v33, 9  ;;  %v730_v42 = vadd.f32 %v3900_v14, %v729_v34  ;;  %v3482_v43 = vpop.f32.mrf.mxu0 }
  0xeb   : > { %v1033_v44 = vmax.f32 %v782_v28, %v3234_v35  ;;  %v1063_v45 = vmax.f32 %v1031_v36, 0.0  ;;  %v1064_v46 = vmax.f32 %v1032_v37, 0.0  ;;  %v1129_v47 = vrot.slane %v1062_v38, %v3910_v26 }
  0xec   : > { %v799_v48 = vcombine.high %v797_v39, %v797_v39  ;;  %v3236_v49 = vrot.slane %v798_v40, 9  ;;  %v3237_v50 = vrot.slane %v797_v39, 9  ;;  %v1034_v51 = vmax.f32 %v790_v33, %v3235_v41  ;;  %v732_v52 = vpop.f32.mrf.mxu0 }
  0xed   : > { %v1065_v53 = vmax.f32 %v1033_v44, 0.0  ;;  %v1133_v54 = vrot.slane %v1063_v45, %v3910_v26  ;;  %v1137_v55 = vrot.slane %v1064_v46, %v3910_v26  ;;  %v800_v56 = vcombine.high %v730_v42, %v730_v42 }
  0xee   : > { %v3238_v57 = vrot.slane %v799_v48, 9  ;;  %v1035_v58 = vmax.f32 %v798_v40, %v3236_v49  ;;  %v1036_v59 = vmax.f32 %v797_v39, %v3237_v50  ;;  %v1066_v60 = vmax.f32 %v1034_v51, 0.0  ;;  %v3483_v61 = vpop.f32.mrf.mxu0 }
  0xef   : > { %v1141_v62 = vrot.slane %v1065_v53, %v3910_v26  ;;  %v1255_v63 = vsel %vm1254_vm2, %v1133_v54, %v1129_v47  ;;  %v807_v0 = vrot.slane %v730_v42, %v3903_v15  ;;  %v814_v2 = vrot.slane %v800_v56, %v3903_v15 }
  0xf0   : > { %v1257_v3 = vsel %vm1256_vm3, %v1137_v55, %v1255_v63  ;;  %v1037_v4 = vmax.f32 %v799_v48, %v3238_v57  ;;  %v1067_v5 = vmax.f32 %v1035_v58, 0.0  ;;  %v1068_v6 = vmax.f32 %v1036_v59, 0.0  ;;  %v737_v7 = vpop.f32.mrf.mxu0 }
  0xf1   : > { %v1145_v8 = vrot.slane %v1066_v60, %v3910_v26  ;;  %v1259_v9 = vsel %vm1258_vm4, %v1141_v62, %v1257_v3  ;;  %v815_v10 = vcombine.high %v807_v0, %v807_v0  ;;  %v816_v11 = vcombine.high %v814_v2, %v814_v2 }
  0xf2   : > { %v1069_v12 = vmax.f32 %v1037_v4, 0.0  ;;  %v3926_v16 = vrot.slane %v1067_v5, %v3910_v26  ;;  %v3929_v17 = vrot.slane %v1068_v6, %v3910_v26  ;;  %v3239_v18 = vrot.slane %v807_v0, 9  ;;  %v3486_v19 = vpop.f32.mrf.mxu0 }
  0xf3   : > { %v3932_v20 = vsel %vm1260_vm5, %v1145_v8, %v1259_v9  ;;  %v3240_v21 = vrot.slane %v815_v10, 9  ;;  %v3241_v22 = vrot.slane %v814_v2, 9  ;;  %v3242_v23 = vrot.slane %v816_v11, 9 }
  0xf4   : > { %v1157_v24 = vrot.slane %v1069_v12, %v3910_v26  ;;  %v1038_v25 = vmax.f32 %v807_v0, %v3239_v18  ;;  %v733_v27 = vadd.f32 %v3900_v14, %v732_v52  ;;  %v738_v28 = vadd.f32 %v3900_v14, %v737_v7  ;;  %v740_v29 = vpop.f32.mrf.mxu0 }
  0xf5   : > { %v1039_v30 = vmax.f32 %v815_v10, %v3240_v21  ;;  %v1040_v31 = vmax.f32 %v814_v2, %v3241_v22  ;;  %v1041_v32 = vmax.f32 %v816_v11, %v3242_v23  ;;  %v3938_v33 = vadd.f32 %v3900_v14, %v740_v29 }
  0xf6   : > { %v1070_v34 = vmax.f32 %v1038_v25, 0.0  ;;  %v817_v35 = vcombine.high %v733_v27, %v733_v27  ;;  %v824_v36 = vrot.slane %v733_v27, %v3903_v15  ;;  %v834_v37 = vcombine.high %v738_v28, %v738_v28  ;;  %v3487_v38 = vpop.f32.mrf.mxu0 }
  0xf7   : > { %v1071_v39 = vmax.f32 %v1039_v30, 0.0  ;;  %v1072_v40 = vmax.f32 %v1040_v31, 0.0  ;;  %v1073_v41 = vmax.f32 %v1041_v32, 0.0  ;;  %v841_v42 = vrot.slane %v738_v28, %v3903_v15 }
  0xf8   : > { %v1161_v43 = vrot.slane %v1070_v34, %v3910_v26  ;;  %v831_v44 = vrot.slane %v817_v35, %v3903_v15  ;;  %v832_v45 = vcombine.high %v824_v36, %v824_v36  ;;  %v3243_v46 = vrot.slane %v824_v36, 9  ;;  %v745_v47 = vpop.f32.mrf.mxu0 }
  0xf9   : > { %v1165_v48 = vrot.slane %v1071_v39, %v3910_v26  ;;  %v1169_v49 = vrot.slane %v1072_v40, %v3910_v26  ;;  %v3947_v50 = vrot.slane %v1073_v41, %v3910_v26  ;;  %v848_v51 = vrot.slane %v834_v37, %v3903_v15 }
  0xfa   : > { %v1267_v52 = vsel %vm1266_vm6, %v1161_v43, %v1157_v24  ;;  %v833_v53 = vcombine.high %v831_v44, %v831_v44  ;;  %v3244_v54 = vrot.slane %v832_v45, 9  ;;  %v3245_v55 = vrot.slane %v831_v44, 9  ;;  %v3490_v56 = vpop.f32.mrf.mxu0 }
  0xfb   : > { %v1268_v57 = vsel %vm1254_vm2, %v1165_v48, %v1267_v52  ;;  %v1042_v58 = vmax.f32 %v824_v36, %v3243_v46  ;;  %v849_v59 = vcombine.high %v841_v42, %v841_v42  ;;  %v850_v60 = vcombine.high %v848_v51, %v848_v51 }
  0xfc   : > { %v3953_v61 = vsel %vm1256_vm3, %v1169_v49, %v1268_v57  ;;  %v3246_v62 = vrot.slane %v833_v53, 9  ;;  %v1043_v63 = vmax.f32 %v832_v45, %v3244_v54  ;;  %v1044_v0 = vmax.f32 %v831_v44, %v3245_v55  ;;  %v3955_v2 = vpop.f32.mrf.mxu0 }
  0xfd   : > { %v1074_v3 = vmax.f32 %v1042_v58, 0.0  ;;  %v3247_v4 = vrot.slane %v841_v42, 9  ;;  %v3248_v5 = vrot.slane %v849_v59, 9  ;;  %v3249_v6 = vrot.slane %v848_v51, 9 }
  0xfe   : > { %v1045_v7 = vmax.f32 %v833_v53, %v3246_v62  ;;  %v1075_v8 = vmax.f32 %v1043_v63, 0.0  ;;  %v1076_v9 = vmax.f32 %v1044_v0, 0.0  ;;  %v3250_v10 = vrot.slane %v850_v60, 9  ;;  %v3491_v11 = vpop.f32.mrf.mxu0 }
  0xff   : > { %v3958_v12 = vrot.slane %v1074_v3, %v3910_v26  ;;  %v1046_v18 = vmax.f32 %v841_v42, %v3247_v4  ;;  %v1047_v19 = vmax.f32 %v849_v59, %v3248_v5  ;;  %v1048_v21 = vmax.f32 %v848_v51, %v3249_v6 }
 0x100   : > { %v1077_v22 = vmax.f32 %v1045_v7, 0.0  ;;  %v3961_v23 = vrot.slane %v1075_v8, %v3910_v26  ;;  %v3964_v24 = vrot.slane %v1076_v9, %v3910_v26  ;;  %v1049_v25 = vmax.f32 %v850_v60, %v3250_v10 }
 0x101   : > { %v1078_v27 = vmax.f32 %v1046_v18, 0.0  ;;  %v1079_v28 = vmax.f32 %v1047_v19, 0.0  ;;  %v1080_v29 = vmax.f32 %v1048_v21, 0.0  ;;  %v851_v30 = vcombine.high %v3938_v33, %v3938_v33 }
 0x102   : > { %v1189_v31 = vrot.slane %v1077_v22, %v3910_v26  ;;  %v1081_v32 = vmax.f32 %v1049_v25, 0.0  ;;  %v858_v34 = vrot.slane %v3938_v33, %v3903_v15  ;;  %v746_v35 = vadd.f32 %v3900_v14, %v745_v47 }
 0x103   : > { %v1193_v36 = vrot.slane %v1078_v27, %v3910_v26  ;;  %v1197_v37 = vrot.slane %v1079_v28, %v3910_v26  ;;  %v1201_v38 = vrot.slane %v1080_v29, %v3910_v26  ;;  %v865_v39 = vrot.slane %v851_v30, %v3903_v15 }
 0x104   : > { %v1205_v40 = vrot.slane %v1081_v32, %v3910_v26  ;;  %v866_v41 = vcombine.high %v858_v34, %v858_v34  ;;  %v3251_v42 = vrot.slane %v858_v34, 9  ;;  %v868_v43 = vcombine.high %v746_v35, %v746_v35 }
 0x105   : > { %v1274_v44 = vsel %vm1266_vm6, %v1193_v36, %v1189_v31  ;;  %v867_v33 = vcombine.high %v865_v39, %v865_v39  ;;  %v3253_v45 = vrot.slane %v865_v39, 9  ;;  %v875_v46 = vrot.slane %v746_v35, %v3903_v15 }
 0x106   : > { %v1275_v47 = vsel %vm1254_vm2, %v1197_v37, %v1274_v44  ;;  %v3252_v48 = vrot.slane %v866_v41, 9  ;;  %v1050_v49 = vmax.f32 %v858_v34, %v3251_v42  ;;  %v882_v51 = vrot.slane %v868_v43, %v3903_v15 }
 0x107   : > { %v1276_v52 = vsel %vm1256_vm3, %v1201_v38, %v1275_v47  ;;  %v3254_v53 = vrot.slane %v867_v33, 9  ;;  %v1052_v54 = vmax.f32 %v865_v39, %v3253_v45  ;;  %v883_v55 = vcombine.high %v875_v46, %v875_v46 }
 0x108   : > { %v1051_v56 = vmax.f32 %v866_v41, %v3252_v48  ;;  %v1082_v57 = vmax.f32 %v1050_v49, 0.0  ;;  %v884_v58 = vcombine.high %v882_v51, %v882_v51  ;;  %v3255_v59 = vrot.slane %v875_v46, 9 }
 0x109   : > { %v1053_v60 = vmax.f32 %v867_v33, %v3254_v53  ;;  %v1084_v62 = vmax.f32 %v1052_v54, 0.0  ;;  %v3256_v63 = vrot.slane %v883_v55, 9  ;;  %v3257_v0 = vrot.slane %v882_v51, 9 }
 0x10a   : > { %v1083_v3 = vmax.f32 %v1051_v56, 0.0  ;;  %v1209_v4 = vrot.slane %v1082_v57, %v3910_v26  ;;  %v3258_v5 = vrot.slane %v884_v58, 9  ;;  %v1054_v6 = vmax.f32 %v875_v46, %v3255_v59 }
 0x10b   : > { %v1085_v7 = vmax.f32 %v1053_v60, 0.0  ;;  %v1217_v8 = vrot.slane %v1084_v62, %v3910_v26  ;;  %v1055_v9 = vmax.f32 %v883_v55, %v3256_v63  ;;  %v1056_v10 = vmax.f32 %v882_v51, %v3257_v0  ;;  %v3628_v62 = vld [vmem:[%s4568_s25 + $0x8] sm:$0xff]  }
 0x10c   : > { %v1213_v11 = vrot.slane %v1083_v3, %v3910_v26  ;;  %v1057_v18 = vmax.f32 %v884_v58, %v3258_v5  ;;  %v1086_v19 = vmax.f32 %v1054_v6, 0.0  ;;  %v749_v21 = vadd.f32 %v3900_v14, %v3955_v2  ;;  %v3629_v5 = vld [vmem:[%s4568_s25] sm:$0xff]  }
 0x10d   : > { %v1221_v22 = vrot.slane %v1085_v7, %v3910_v26  ;;  %v1087_v25 = vmax.f32 %v1055_v9, 0.0  ;;  %v1088_v27 = vmax.f32 %v1056_v10, 0.0  ;;  %v1263_v28 = vsel %vm1262_vm7, %v3926_v16, %v3932_v20 }
 0x10e   : > { %v1089_v29 = vmax.f32 %v1057_v18, 0.0  ;;  %v1225_v30 = vrot.slane %v1086_v19, %v3910_v26  ;;  %v885_v31 = vcombine.high %v749_v21, %v749_v21  ;;  %v892_v32 = vrot.slane %v749_v21, %v3903_v15 }
 0x10f   : > { %v1229_v34 = vrot.slane %v1087_v25, %v3910_v26  ;;  %v1233_v35 = vrot.slane %v1088_v27, %v3910_v26  ;;  %v1265_v14 = vsel %vm1264_vm8, %v3929_v17, %v1263_v28  ;;  %v1270_v2 = vsel %vm1258_vm4, %v3947_v50, %v3953_v61  ;;  %v3627_v50 = vld [vmem:[%s4568_s25 + $0x10] sm:$0xff]  }
 0x110   : > { %v1237_v16 = vrot.slane %v1089_v29, %v3910_v26  ;;  %v1281_v20 = vsel %vm1266_vm6, %v1225_v30, %v1221_v22  ;;  %v899_v36 = vrot.slane %v885_v31, %v3903_v15  ;;  %v900_v37 = vcombine.high %v892_v32, %v892_v32  ;;  %3496 = vmatprep.subr.bf16.mxu1 %v3627_v50 }
 0x111   : > { %v1282_v38 = vsel %vm1254_vm2, %v1229_v34, %v1281_v20  ;;  %v3259_v39 = vrot.slane %v892_v32, 9  ;;  %v1271_v41 = vsel %vm1260_vm5, %v3958_v12, %v1270_v2  ;;  %v1277_v17 = vsel %vm1258_vm4, %v1205_v40, %v1276_v52  ;;  %3497 = vmatpush3.bf16.msra.mxu1 %v3627_v50 }
 0x112   : > { %v1283_v61 = vsel %vm1256_vm3, %v1233_v35, %v1282_v38  ;;  %v901_v42 = vcombine.high %v899_v36, %v899_v36  ;;  %v3260_v43 = vrot.slane %v900_v37, 9  ;;  %v3261_v44 = vrot.slane %v899_v36, 9  ;;  %3498 = vmatprep.subr.bf16.mxu1 %v3628_v62 }
 0x113   : > { %v1058_v33 = vmax.f32 %v892_v32, %v3259_v39  ;;  %v1284_v45 = vsel %vm1258_vm4, %v1237_v16, %v1283_v61  ;;  %v1272_v46 = vsel %vm1262_vm7, %v3961_v23, %v1271_v41  ;;  %v1278_v47 = vsel %vm1260_vm5, %v1209_v4, %v1277_v17 }
 0x114   : > { %v3262_v12 = vrot.slane %v901_v42, 9  ;;  %v1059_v40 = vmax.f32 %v900_v37, %v3260_v43  ;;  %v1060_v48 = vmax.f32 %v899_v36, %v3261_v44  ;;  %v4017_v49 = vsel %vm1264_vm8, %v3964_v24, %v1272_v46 }
 0x115   : > { %v1090_v51 = vmax.f32 %v1058_v33, 0.0  ;;  %v1279_v52 = vsel %vm1262_vm7, %v1213_v11, %v1278_v47  ;;  %v1294_v53 = vsel %vm1293_vm9, 0.0, %v1265_v14  ;;  %v1322_v54 = vrot.slane %v4017_v49, 2  ;;  %3499 = vmatpush3.bf16.msra.mxu1 %v3628_v62 }
 0x116   : > { %v1061_v55 = vmax.f32 %v901_v42, %v3262_v12  ;;  %v1091_v23 = vmax.f32 %v1059_v40, 0.0  ;;  %v1092_v56 = vmax.f32 %v1060_v48, 0.0  ;;  %v4023_v57 = vsel %vm1264_vm8, %v1217_v8, %v1279_v52  ;;  %3500 = vmatprep.subr.bf16.mxu1 %v3629_v5 }
 0x117   : > { %v1241_v58 = vrot.slane %v1090_v51, %v3910_v26  ;;  %v1321_v59 = vrot.slane %v1294_v53, 2  ;;  %v1324_v24 = vrot.slane %v4023_v57, 2  ;;  %v1299_v60 = vrot.slane %v1294_v53, 1 }
 0x118   : > { %v1093_v63 = vmax.f32 %v1061_v55, 0.0  ;;  %v1245_v0 = vrot.slane %v1091_v23, %v3910_v26  ;;  %v1249_v3 = vrot.slane %v1092_v56, %v3910_v26  ;;  %v1300_v4 = vrot.slane %v4017_v49, 1  ;;  %v3632_v55 = vld [vmem:[%s4544_s5 + $0x18] sm:$0xff]   ;;  %v3633_v23 = vld [vmem:[%s4544_s5 + $0x10] sm:$0xff]   ;;  %v3634_v56 = vld [vmem:[%s4544_s5 + $0x8] sm:$0xff]  }
 0x119   : > { %v1285_v6 = vsel %vm1260_vm5, %v1241_v58, %v1284_v45  ;;  %v1323_v7 = vsel %vm1320_vm10, %v1321_v59, %v1322_v54  ;;  %v1325_v8 = vsel %vm1320_vm10, %v1322_v54, %v1324_v24  ;;  %v1302_v9 = vrot.slane %v4023_v57, 1  ;;  %3501 = vmatpush3.bf16.msra.mxu1 %v3629_v5  ;;  %v3631_v54 = vld [vmem:[%s4544_s5 + $0x20] sm:$0xff]  }
 0x11a   : > { %v3599_v10 = vpack.i.bf16 %v1325_v8, %v1323_v7  ;;  %v1253_v11 = vrot.slane %v1093_v63, %v3910_v26  ;;  %v1286_v18 = vsel %vm1262_vm7, %v1245_v0, %v1285_v6  ;;  %v1301_v19 = vsel %vm1298_vm11, %v1299_v60, %v1300_v4  ;;  %3506 = vmatprep.subr.bf16.mxu1 %v3737_v1  ;;  %v3263_v58 = vld [vmem:[%s4543_s4] ss:$0 sm:$0xff] }
 0x11b   : > { %v1303_v21 = vsel %vm1298_vm11, %v1300_v4, %v1302_v9  ;;  %v1287_v22 = vsel %vm1264_vm8, %v1249_v3, %v1286_v18 }
 0x11c   : > { %3600 = vrot.lane.b32.xlu1 %v3599_v10, %s3740_s20  ;;  %v3589_v25 = vpack.i.bf16 %v1303_v21, %v1301_v19  ;;  %v1295_v27 = vsel %vm1293_vm9, %v1253_v11, 0.0  ;;  %v1326_v28 = vrot.slane %v1287_v22, 2  ;;  %v1304_v29 = vrot.slane %v1287_v22, 1 }
 0x11d   : > { %v1328_v30 = vrot.slane %v1295_v27, 2  ;;  %v1306_v31 = vrot.slane %v1295_v27, 1 }
 0x11e   : > { %3590 = vrot.lane.b32.xlu0 %v3589_v25, %s3741_s21  ;;  %v1327_v32 = vsel %vm1320_vm10, %v1324_v24, %v1326_v28  ;;  %v1305_v34 = vsel %vm1298_vm11, %v1302_v9, %v1304_v29 }
 0x11f   : > { %v1329_v35 = vsel %vm1320_vm10, %v1326_v28, %v1328_v30  ;;  %v1307_v14 = vsel %vm1298_vm11, %v1304_v29, %v1306_v31 }
 0x120   : > { %v3604_v2 = vpack.i.bf16 %v1329_v35, %v1327_v32  ;;  %v3594_v16 = vpack.i.bf16 %v1307_v14, %v1305_v34 }
 0x122   : > { %3605 = vrot.lane.b32.xlu1 %v3604_v2, %s3740_s20  ;;  %3595 = vrot.lane.b32.xlu0 %v3594_v16, %s3741_s21 }
 0x18e   : > { %v3601_v20 = vpop.permute.xlu1 %3600 }
 0x18f   : > { %v3603_v36 = vunpack.i.h.bf16 %v3601_v20  ;;  %v3602_v37 = vunpack.i.l.bf16 %v3601_v20 }
 0x190   : > { %v3591_v38 = vpop.permute.xlu0 %3590 }
 0x191   : > { %v3593_v39 = vunpack.i.h.bf16 %v3591_v38  ;;  %v3592_v41 = vunpack.i.l.bf16 %v3591_v38 }
 0x193   : > { %v1343_v17 = vsel %vm1342_vm12, %v1294_v53, %v3592_v41  ;;  %v1344_v50 = vsel %vm1342_vm12, %v4017_v49, %v3593_v39  ;;  %v3630_v53 = vld [vmem:[%s4544_s5 + $0x28] sm:$0xff]  }
 0x194   : > { %v1348_v61 = vsel %vm1347_vm13, %v1343_v17, %v3602_v37  ;;  %v1349_v42 = vsel %vm1347_vm13, %v1344_v50, %v3603_v36  ;;  %v3606_v43 = vpop.permute.xlu1 %3605  ;;  %v3596_v44 = vpop.permute.xlu0 %3595 }
 0x195   : > { %v1352_v33 = vpack.c.bf16 %v1349_v42, %v1348_v61  ;;  %v3608_v45 = vunpack.i.h.bf16 %v3606_v43  ;;  %v3607_v46 = vunpack.i.l.bf16 %v3606_v43  ;;  %v3598_v47 = vunpack.i.h.bf16 %v3596_v44 }
 0x196   : > { %v3597_v12 = vunpack.i.l.bf16 %v3596_v44 }
 0x197   : > { %3502 = vmatprep.mubr.msk.bf16.mxu1 %vm1385_vm14, %v1352_v33  ;;  %v1346_v40 = vsel %vm1342_vm12, %v1287_v22, %v3598_v47 }
 0x198   : > { %v1345_v48 = vsel %vm1342_vm12, %v4023_v57, %v3597_v12  ;;  %v1351_v49 = vsel %vm1347_vm13, %v1346_v40, %v3608_v45 }
 0x199   : > { %v1350_v51 = vsel %vm1347_vm13, %v1345_v48, %v3607_v46 }
 0x19a   : > { %v1353_v52 = vpack.c.bf16 %v1351_v49, %v1350_v51 }
 0x19c   : > { %3503 = vmatmul.mubr.msk.bf16.vlgmr.msra.gmra.mxu1 %vm1385_vm14, %v1353_v52 }
 0x19d   : > { %3518 = vmatprep.mubr.msk.bf16.mxu1 %vm3738_vm0, %v3737_v1  ;;  %3507 = vmatpush3.bf16.msra.mxu1 %v3630_v53 }
 0x19e   : > { %3508 = vmatprep.subr.bf16.mxu1 %v3737_v1 }
 0x1a1   : > { %3509 = vmatpush3.bf16.msra.mxu1 %v3631_v54 }
 0x1a2   : > { %3510 = vmatprep.subr.bf16.mxu1 %v3737_v1 }
 0x1a5   : > { %3511 = vmatpush3.bf16.msra.mxu1 %v3632_v55 }
 0x1a6   : > { %3512 = vmatprep.subr.bf16.mxu1 %v3737_v1 }
 0x1a9   : > { %3513 = vmatpush3.bf16.msra.mxu1 %v3633_v23 }
 0x1aa   : > { %3514 = vmatprep.subr.bf16.mxu1 %v3737_v1 }
 0x1ad   : > { %3515 = vmatpush3.bf16.msra.mxu1 %v3634_v56 }
 0x1ae   : > { %3516 = vmatprep.subr.bf16.mxu1 %v3737_v1 }
 0x25c   : > { %v3504_v57 = vpop.f32.mrf.mxu1 }
 0x25d   : > { %v1435_v62 = vadd.f32 %v3504_v57, %v3263_v58 }
 0x25e   : > { %v1426_v59 = vpop.f32.mrf.mxu1 }
 0x25f   : > { %v1427_v24 = vadd.f32 %v3263_v58, %v1426_v59  ;;  %v1479_v7 = vcombine.high %v1435_v62, %v1435_v62  ;;  %v1486_v8 = vrot.slane %v1435_v62, %v3903_v15 }
 0x260   : > { %v3505_v60 = vpop.f32.mrf.mxu1 }
 0x261   : > { %v1445_v63 = vcombine.high %v1427_v24, %v1427_v24  ;;  %v1452_v0 = vrot.slane %v1427_v24, %v3903_v15  ;;  %v1438_v3 = vadd.f32 %v3505_v60, %v3263_v58  ;;  %v1493_v27 = vrot.slane %v1479_v7, %v3903_v15 }
 0x262   : > { %v1494_v28 = vcombine.high %v1486_v8, %v1486_v8  ;;  %v1429_v29 = vpop.f32.mrf.mxu1  ;;  %v3277_v34 = vrot.slane %v1486_v8, 9 }
 0x263   : > { %v1459_v4 = vrot.slane %v1445_v63, %v3903_v15  ;;  %v1460_v5 = vcombine.high %v1452_v0, %v1452_v0  ;;  %v3269_v6 = vrot.slane %v1452_v0, 9  ;;  %v1496_v19 = vcombine.high %v1438_v3, %v1438_v3 }
 0x264   : > { %v1503_v14 = vrot.slane %v1438_v3, %v3903_v15  ;;  %v1430_v20 = vadd.f32 %v3263_v58, %v1429_v29  ;;  %v1495_v36 = vcombine.high %v1493_v27, %v1493_v27  ;;  %v3278_v37 = vrot.slane %v1494_v28, 9 }
 0x265   : > { %v1461_v9 = vcombine.high %v1459_v4, %v1459_v4  ;;  %v3270_v10 = vrot.slane %v1460_v5, 9  ;;  %v3271_v11 = vrot.slane %v1459_v4, 9  ;;  %v1577_v18 = vmax.f32 %v1452_v0, %v3269_v6 }
 0x266   : > { %v1510_v2 = vrot.slane %v1496_v19, %v3903_v15  ;;  %v3279_v38 = vrot.slane %v1493_v27, 9  ;;  %v1462_v50 = vcombine.high %v1430_v20, %v1430_v20  ;;  %v1469_v61 = vrot.slane %v1430_v20, %v3903_v15 }
 0x267   : > { %v3272_v21 = vrot.slane %v1461_v9, 9  ;;  %v1578_v22 = vmax.f32 %v1460_v5, %v3270_v10  ;;  %v1579_v25 = vmax.f32 %v1459_v4, %v3271_v11  ;;  %v1593_v31 = vmax.f32 %v1577_v18, 0.0 }
 0x268   : > { %v1512_v39 = vcombine.high %v1510_v2, %v1510_v2  ;;  %v1585_v42 = vmax.f32 %v1486_v8, %v3277_v34  ;;  %v1511_v44 = vcombine.high %v1503_v14, %v1503_v14  ;;  %v1476_v46 = vrot.slane %v1462_v50, %v3903_v15 }
 0x269   : > { %v1580_v30 = vmax.f32 %v1461_v9, %v3272_v21  ;;  %v1594_v32 = vmax.f32 %v1578_v22, 0.0  ;;  %v1595_v35 = vmax.f32 %v1579_v25, 0.0  ;;  %v1628_v17 = vrot.slane %v1593_v31, %v3910_v26 }
 0x26a   : > { %v3284_v33 = vrot.slane %v1512_v39, 9  ;;  %v1477_v47 = vcombine.high %v1469_v61, %v1469_v61  ;;  %v3273_v12 = vrot.slane %v1469_v61, 9  ;;  %v3280_v40 = vrot.slane %v1495_v36, 9 }
 0x26b   : > { %v1632_v16 = vrot.slane %v1594_v32, %v3910_v26  ;;  %v1596_v41 = vmax.f32 %v1580_v30, 0.0  ;;  %v1636_v43 = vrot.slane %v1595_v35, %v3910_v26  ;;  %v1586_v48 = vmax.f32 %v1494_v28, %v3278_v37 }
 0x26c   : > { %v1587_v49 = vmax.f32 %v1493_v27, %v3279_v38  ;;  %v3281_v51 = vrot.slane %v1503_v14, 9  ;;  %v1478_v53 = vcombine.high %v1476_v46, %v1476_v46  ;;  %v3274_v54 = vrot.slane %v1477_v47, 9 }
 0x26d   : > { %v1689_v45 = vsel %vm1254_vm2, %v1632_v16, %v1628_v17  ;;  %v1640_v52 = vrot.slane %v1596_v41, %v3910_v26  ;;  %v3275_v55 = vrot.slane %v1476_v46, 9  ;;  %v3282_v56 = vrot.slane %v1511_v44, 9 }
 0x26e   : > { %v1690_v23 = vsel %vm1256_vm3, %v1636_v43, %v1689_v45  ;;  %v1592_v57 = vmax.f32 %v1512_v39, %v3284_v33  ;;  %v1581_v58 = vmax.f32 %v1469_v61, %v3273_v12  ;;  %v3283_v59 = vrot.slane %v1510_v2, 9  ;;  %v3635_v43 = vld [vmem:[%s4544_s5] sm:$0xff]  }
 0x26f   : > { %v3276_v24 = vrot.slane %v1478_v53, 9  ;;  %v1582_v60 = vmax.f32 %v1477_v47, %v3274_v54  ;;  %v1583_v62 = vmax.f32 %v1476_v46, %v3275_v55  ;;  %v1588_v63 = vmax.f32 %v1495_v36, %v3280_v40  ;;  %3517 = vmatpush3.bf16.msra.mxu1 %v3635_v43 }
 0x270   : > { %v1601_v0 = vmax.f32 %v1585_v42, 0.0  ;;  %v1589_v3 = vmax.f32 %v1503_v14, %v3281_v51  ;;  %v1597_v4 = vmax.f32 %v1581_v58, 0.0  ;;  %v1691_v8 = vsel %vm1258_vm4, %v1640_v52, %v1690_v23 }
 0x271   : > { %v1584_v5 = vmax.f32 %v1478_v53, %v3276_v24  ;;  %v1598_v6 = vmax.f32 %v1582_v60, 0.0  ;;  %v1599_v7 = vmax.f32 %v1583_v62, 0.0  ;;  %v1602_v9 = vmax.f32 %v1586_v48, 0.0 }
 0x272   : > { %v1590_v10 = vmax.f32 %v1511_v44, %v3282_v56  ;;  %v1608_v11 = vmax.f32 %v1592_v57, 0.0  ;;  %v1644_v18 = vrot.slane %v1597_v4, %v3910_v26  ;;  %v1603_v19 = vmax.f32 %v1587_v49, 0.0 }
 0x273   : > { %v1591_v21 = vmax.f32 %v1510_v2, %v3283_v59  ;;  %v1600_v22 = vmax.f32 %v1584_v5, 0.0  ;;  %v1648_v25 = vrot.slane %v1598_v6, %v3910_v26  ;;  %v1604_v27 = vmax.f32 %v1588_v63, 0.0 }
 0x274   : > { %v1652_v28 = vrot.slane %v1599_v7, %v3910_v26  ;;  %v1692_v29 = vsel %vm1260_vm5, %v1644_v18, %v1691_v8  ;;  %v1660_v30 = vrot.slane %v1601_v0, %v3910_v26  ;;  %v1605_v31 = vmax.f32 %v1589_v3, 0.0  ;;  %v3636_v7 = vld [vmem:[%s3873_s28 + $0x20] ss:$0 sps:$4 sm:$0x11]   ;;  %v3637_v8 = vld [vmem:[%s4546_s7 + $0x38] sm:$0xff]  }
 0x275   : > { %v1656_v32 = vrot.slane %v1600_v22, %v3910_v26  ;;  %v1693_v34 = vsel %vm1262_vm7, %v1648_v25, %v1692_v29  ;;  %v1664_v35 = vrot.slane %v1602_v9, %v3910_v26  ;;  %v1606_v14 = vmax.f32 %v1590_v10, 0.0  ;;  %3493 = vmatmul.mubr.msk.bf16.gmra.mxu0 %vm671_vm1, %v3636_v7  ;;  %v3638_v10 = vld [vmem:[%s4546_s7 + $0x30] sm:$0xff]   ;;  %v3640_v18 = vld [vmem:[%s4546_s7 + $0x20] sm:$0xff]   ;;  %v3643_v22 = vld [vmem:[%s4546_s7 + $0x8] sm:$0xff]  }
 0x276   : > { %v1688_v2 = vrot.slane %v1608_v11, %v3910_v26  ;;  %v1668_v16 = vrot.slane %v1603_v19, %v3910_v26  ;;  %v1607_v20 = vmax.f32 %v1591_v21, 0.0  ;;  %v1672_v37 = vrot.slane %v1604_v27, %v3910_v26  ;;  %v3639_v11 = vld [vmem:[%s4546_s7 + $0x28] sm:$0xff]   ;;  %v3641_v19 = vld [vmem:[%s4546_s7 + $0x18] sm:$0xff]   ;;  %v3642_v21 = vld [vmem:[%s4546_s7 + $0x10] sm:$0xff]  }
 0x277   : > { %v1695_v36 = vsel %vm1266_vm6, %v1660_v30, %v1656_v32  ;;  %v1694_v39 = vsel %vm1264_vm8, %v1652_v28, %v1693_v34  ;;  %v1676_v41 = vrot.slane %v1605_v31, %v3910_v26  ;;  %v1680_v50 = vrot.slane %v1606_v14, %v3910_v26  ;;  %v3644_v25 = vld [vmem:[%s4546_s7] sm:$0xff]   ;;  %v3645_v27 = vld [vmem:[%s4546_s7 + $0x58] sm:$0xff]   ;;  %v3646_v28 = vld [vmem:[%s4546_s7 + $0x50] sm:$0xff]  }
 0x278   : > { %v1696_v38 = vsel %vm1254_vm2, %v1664_v35, %v1695_v36  ;;  %v1706_v42 = vsel %vm1293_vm9, %v1688_v2, 0.0  ;;  %v1684_v44 = vrot.slane %v1607_v20, %v3910_v26  ;;  %v1705_v45 = vsel %vm1293_vm9, 0.0, %v1694_v39  ;;  %v3647_v29 = vld [vmem:[%s4546_s7 + $0x48] sm:$0xff]   ;;  %v3285_v30 = vld [vmem:[%s4545_s6] ss:$0 sm:$0xff] }
 0x279   : > { %v1697_v17 = vsel %vm1256_vm3, %v1668_v16, %v1696_v38  ;;  %v1723_v12 = vrot.slane %v1706_v42, 2  ;;  %v1712_v40 = vrot.slane %v1706_v42, 1  ;;  %v1720_v48 = vrot.slane %v1705_v45, 2 }
 0x27a   : > { %v1698_v61 = vsel %vm1258_vm4, %v1672_v37, %v1697_v17  ;;  %v1709_v51 = vrot.slane %v1705_v45, 1  ;;  %v3743_v9 = vmov 0  }
 0x27b   : > { %v1699_v33 = vsel %vm1260_vm5, %v1676_v41, %v1698_v61  ;;  %2091 = vmatprep.subr.bf16.mxu0 %v3743_v9  ;;  %2316 = vmatprep.subr.bf16.mxu1 %v3743_v9 }
 0x27c   : > { %v1700_v46 = vsel %vm1262_vm7, %v1680_v50, %v1699_v33  ;;  %2092 = vmatpush1.bf16.msra.mxu0 %v3637_v8 }
 0x27d   : > { %v1701_v47 = vsel %vm1264_vm8, %v1684_v44, %v1700_v46  ;;  %2093 = vmatprep.subr.bf16.mxu0 %v3743_v9 }
 0x27e   : > { %v1721_v49 = vrot.slane %v1701_v47, 2  ;;  %v1710_v52 = vrot.slane %v1701_v47, 1 }
 0x280   : > { %v1722_v53 = vsel %vm1320_vm10, %v1720_v48, %v1721_v49  ;;  %v1724_v54 = vsel %vm1320_vm10, %v1721_v49, %v1723_v12  ;;  %v1711_v55 = vsel %vm1298_vm11, %v1709_v51, %v1710_v52  ;;  %v1713_v23 = vsel %vm1298_vm11, %v1710_v52, %v1712_v40  ;;  %2094 = vmatpush1.bf16.msra.mxu0 %v3638_v10 }
 0x281   : > { %v3614_v56 = vpack.i.bf16 %v1724_v54, %v1722_v53  ;;  %v3609_v57 = vpack.i.bf16 %v1713_v23, %v1711_v55  ;;  %2095 = vmatprep.subr.bf16.mxu0 %v3743_v9 }
 0x283   : > { %3615 = vrot.lane.b32.xlu1 %v3614_v56, %s3742_s26  ;;  %3610 = vrot.lane.b32.xlu0 %v3609_v57, %s3740_s20 }
 0x284   : > { %2096 = vmatpush1.bf16.msra.mxu0 %v3639_v11 }
 0x285   : > { %2097 = vmatprep.subr.bf16.mxu0 %v3743_v9 }
 0x288   : > { %2098 = vmatpush1.bf16.msra.mxu0 %v3640_v18 }
 0x289   : > { %2099 = vmatprep.subr.bf16.mxu0 %v3743_v9 }
 0x28c   : > { %2100 = vmatpush1.bf16.msra.mxu0 %v3641_v19 }
 0x28d   : > { %2101 = vmatprep.subr.bf16.mxu0 %v3743_v9 }
 0x290   : > { %2102 = vmatpush1.bf16.msra.mxu0 %v3642_v21 }
 0x291   : > { %2103 = vmatprep.subr.bf16.mxu0 %v3743_v9 }
 0x294   : > { %2104 = vmatpush1.bf16.msra.mxu0 %v3643_v22 }
 0x295   : > { %2105 = vmatprep.subr.bf16.mxu0 %v3743_v9 }
 0x298   : > { %2106 = vmatpush1.bf16.msra.mxu0 %v3644_v25 }
 0x299   : > { %2115 = vmatprep.subr.bf16.mxu0 %v3743_v9 }
 0x29c   : > { %2116 = vmatpush2.bf16.msra.mxu0 %v3645_v27 }
 0x29d   : > { %2117 = vmatprep.subr.bf16.mxu0 %v3743_v9 }
 0x2a0   : > { %2118 = vmatpush2.bf16.msra.mxu0 %v3646_v28 }
 0x2a1   : > { %2119 = vmatprep.subr.bf16.mxu0 %v3743_v9 }
 0x2a4   : > { %2120 = vmatpush2.bf16.msra.mxu0 %v3647_v29 }
 0x2a5   : > { %2121 = vmatprep.subr.bf16.mxu0 %v3743_v9 }
 0x2f5   : > { %v3616_v58 = vpop.permute.xlu1 %3615  ;;  %v3611_v59 = vpop.permute.xlu0 %3610 }
 0x2f6   : > { %v3618_v24 = vunpack.i.h.bf16 %v3616_v58  ;;  %v3617_v60 = vunpack.i.l.bf16 %v3616_v58  ;;  %v3613_v62 = vunpack.i.h.bf16 %v3611_v59  ;;  %v3612_v63 = vunpack.i.l.bf16 %v3611_v59 }
 0x2f8   : > { %v1732_v0 = vsel %vm1347_vm13, %v1701_v47, %v3613_v62  ;;  %v1731_v3 = vsel %vm1347_vm13, %v1705_v45, %v3612_v63  ;;  %v3648_v62 = vld [vmem:[%s4546_s7 + $0x40] sm:$0xff]  }
 0x2f9   : > { %v1734_v4 = vsel %vm671_vm1, %v1732_v0, %v3618_v24  ;;  %v1733_v5 = vsel %vm671_vm1, %v1731_v3, %v3617_v60  ;;  %2122 = vmatpush2.bf16.msra.mxu0 %v3648_v62 }
 0x2fa   : > { %v1735_v6 = vpack.c.bf16 %v1734_v4, %v1733_v5  ;;  %2508 = vmatprep.subr.bf16.mxu0 %v3743_v9 }
 0x2fc   : > { %3519 = vmatmul.mubr.msk.bf16.vlgmr.msra.gmra.mxu1 %vm1791_vm15, %v1735_v6 }
 0x3bc   : > { %v1829_v31 = vpop.f32.mrf.mxu1 }
 0x3bd   : > { %v1830_v32 = vadd.f32 %v3285_v30, %v1829_v31 }
 0x3be   : > { %v3520_v34 = vpop.f32.mrf.mxu1 }
 0x3bf   : > { %v1838_v35 = vcombine.high %v1830_v32, %v1830_v32  ;;  %v1845_v14 = vrot.slane %v1830_v32, %v3903_v15 }
 0x3c0   : > { %v1832_v2 = vpop.f32.mrf.mxu1 }
 0x3c1   : > { %v1852_v16 = vrot.slane %v1838_v35, %v3903_v15  ;;  %v1853_v20 = vcombine.high %v1845_v14, %v1845_v14  ;;  %v3293_v36 = vrot.slane %v1845_v14, 9  ;;  %v1833_v37 = vadd.f32 %v3285_v30, %v1832_v2  ;;  %v753_v2 = vpop.f32.mrf.mxu0 }
 0x3c2   : > { %v3521_v38 = vpop.f32.mrf.mxu1  ;;  %v3663_v2 = vld [vmem:[%s4550_s11 + $0x28] sm:$0xff]  }
 0x3c3   : > { %v1854_v39 = vcombine.high %v1852_v16, %v1852_v16  ;;  %v3294_v41 = vrot.slane %v1853_v20, 9  ;;  %v3295_v17 = vrot.slane %v1852_v16, 9  ;;  %v1904_v50 = vmax.f32 %v1845_v14, %v3293_v36 }
 0x3c4   : > { %v1855_v61 = vcombine.high %v1833_v37, %v1833_v37  ;;  %v1862_v42 = vrot.slane %v1833_v37, %v3903_v15 }
 0x3c5   : > { %v3296_v43 = vrot.slane %v1854_v39, 9  ;;  %v1905_v44 = vmax.f32 %v1853_v20, %v3294_v41  ;;  %v1906_v33 = vmax.f32 %v1852_v16, %v3295_v17  ;;  %v1912_v45 = vmax.f32 %v1904_v50, 0.0  ;;  %v3494_v16 = vpop.f32.mrf.mxu0  ;;  %v3649_v41 = vld [vmem:[%s4548_s9 + $0x38] sm:$0xff]   ;;  %v3650_v17 = vld [vmem:[%s4548_s9 + $0x30] sm:$0xff]   ;;  %v3651_v50 = vld [vmem:[%s4548_s9 + $0x28] sm:$0xff]  }
 0x3c6   : > { %v1869_v46 = vrot.slane %v1855_v61, %v3903_v15  ;;  %v1870_v47 = vcombine.high %v1862_v42, %v1862_v42  ;;  %v3297_v12 = vrot.slane %v1862_v42, 9  ;;  %2317 = vmatpush1.bf16.msra.mxu1 %v3649_v41  ;;  %v3652_v61 = vld [vmem:[%s4548_s9 + $0x20] sm:$0xff]   ;;  %v3670_v41 = vld [vmem:[%s4550_s11 + $0x50] sm:$0xff]  }
 0x3c7   : > { %v1907_v40 = vmax.f32 %v1854_v39, %v3296_v43  ;;  %v1913_v48 = vmax.f32 %v1905_v44, 0.0  ;;  %v1914_v49 = vmax.f32 %v1906_v33, 0.0  ;;  %v1931_v23 = vrot.slane %v1912_v45, %v3910_v26  ;;  %v755_v20 = vpop.f32.mrf.mxu0  ;;  %2318 = vmatprep.subr.bf16.mxu1 %v3743_v9  ;;  %v3654_v43 = vld [vmem:[%s4548_s9 + $0x10] sm:$0xff]   ;;  %v3655_v44 = vld [vmem:[%s4548_s9 + $0x8] sm:$0xff]   ;;  %v3656_v33 = vld [vmem:[%s4548_s9] sm:$0xff]  }
 0x3c8   : > { %v1871_v51 = vcombine.high %v1869_v46, %v1869_v46  ;;  %v3298_v52 = vrot.slane %v1870_v47, 9  ;;  %v3299_v53 = vrot.slane %v1869_v46, 9  ;;  %v1908_v54 = vmax.f32 %v1862_v42, %v3297_v12  ;;  %v3653_v42 = vld [vmem:[%s4548_s9 + $0x18] sm:$0xff]   ;;  %v3301_v12 = vld [vmem:[%s4547_s8] ss:$0 sm:$0xff] }
 0x3c9   : > { %v1915_v55 = vmax.f32 %v1907_v40, 0.0  ;;  %v1935_v56 = vrot.slane %v1913_v48, %v3910_v26  ;;  %v1939_v57 = vrot.slane %v1914_v49, %v3910_v26  ;;  %v3495_v36 = vpop.f32.mrf.mxu0  ;;  %v3657_v45 = vld [vmem:[%s4548_s9 + $0x58] sm:$0xff]   ;;  %v3664_v16 = vld [vmem:[%s4550_s11 + $0x20] sm:$0xff]  }
 0x3ca   : > { %v3300_v58 = vrot.slane %v1871_v51, 9  ;;  %v1909_v59 = vmax.f32 %v1870_v47, %v3298_v52  ;;  %v1910_v24 = vmax.f32 %v1869_v46, %v3299_v53  ;;  %v1916_v60 = vmax.f32 %v1908_v54, 0.0  ;;  %2319 = vmatpush1.bf16.msra.mxu1 %v3650_v17  ;;  %v3658_v46 = vld [vmem:[%s4548_s9 + $0x50] sm:$0xff]   ;;  %v3659_v47 = vld [vmem:[%s4548_s9 + $0x48] sm:$0xff]   ;;  %v3665_v20 = vld [vmem:[%s4550_s11 + $0x18] sm:$0xff]  }
 0x3cb   : > { %v1943_v63 = vrot.slane %v1915_v55, %v3910_v26  ;;  %v1960_v0 = vsel %vm1254_vm2, %v1935_v56, %v1931_v23  ;;  %2320 = vmatprep.subr.bf16.mxu1 %v3743_v9  ;;  %v3666_v36 = vld [vmem:[%s4550_s11 + $0x10] sm:$0xff]   ;;  %v3671_v17 = vld [vmem:[%s4550_s11 + $0x48] sm:$0xff]  }
 0x3cc   : > { %v1961_v3 = vsel %vm1256_vm3, %v1939_v57, %v1960_v0  ;;  %v1911_v4 = vmax.f32 %v1871_v51, %v3300_v58  ;;  %v1917_v5 = vmax.f32 %v1909_v59, 0.0  ;;  %v1918_v6 = vmax.f32 %v1910_v24, 0.0 }
 0x3cd   : > { %v1947_v7 = vrot.slane %v1916_v60, %v3910_v26  ;;  %v1962_v8 = vsel %vm1258_vm4, %v1943_v63, %v1961_v3  ;;  %v3660_v3 = vld [vmem:[%s4548_s9 + $0x40] sm:$0xff]  }
 0x3ce   : > { %v1951_v10 = vrot.slane %v1917_v5, %v3910_v26  ;;  %v1955_v11 = vrot.slane %v1918_v6, %v3910_v26  ;;  %v1919_v18 = vmax.f32 %v1911_v4, 0.0  ;;  %2321 = vmatpush1.bf16.msra.mxu1 %v3651_v50  ;;  %v3319_v50 = vld [vmem:[%s4549_s10] ss:$0 sm:$0xff] }
 0x3cf   : > { %v1963_v19 = vsel %vm1260_vm5, %v1947_v7, %v1962_v8  ;;  %2322 = vmatprep.subr.bf16.mxu1 %v3743_v9  ;;  %vm2198_vm5 = vcmask 1044480  }
 0x3d0   : > { %v1959_v21 = vrot.slane %v1919_v18, %v3910_v26  ;;  %v1964_v22 = vsel %vm1262_vm7, %v1951_v10, %v1963_v19 }
 0x3d1   : > { %v1965_v25 = vsel %vm1264_vm8, %v1955_v11, %v1964_v22 }
 0x3d2   : > { %v1968_v27 = vsel %vm1293_vm9, 0.0, %v1965_v25  ;;  %v1969_v28 = vsel %vm1293_vm9, %v1959_v21, 0.0  ;;  %2323 = vmatpush1.bf16.msra.mxu1 %v3652_v61 }
 0x3d3   : > { %v1972_v29 = vrot.slane %v1968_v27, 1  ;;  %v1973_v30 = vrot.slane %v1969_v28, 1  ;;  %v1978_v31 = vrot.slane %v1968_v27, 2  ;;  %v1979_v32 = vrot.slane %v1969_v28, 2  ;;  %2324 = vmatprep.subr.bf16.mxu1 %v3743_v9 }
 0x3d5   : > { %v1974_v34 = vsel %vm1298_vm11, %v1972_v29, %v1973_v30  ;;  %v1980_v35 = vsel %vm1320_vm10, %v1978_v31, %v1979_v32 }
 0x3d6   : > { %1975 = vrot.lane.b32.xlu0 %v1974_v34, %s3742_s26  ;;  %v1984_v14 = vpack.c.bf16 %v1980_v35, %v1980_v35  ;;  %2325 = vmatpush1.bf16.msra.mxu1 %v3653_v42  ;;  %v3661_v35 = vld [vmem:[%s4550_s11 + $0x38] sm:$0xff]  }
 0x3d7   : > { %2326 = vmatprep.subr.bf16.mxu1 %v3743_v9 }
 0x3d8   : > { %3314 = vmatprep.mubr.msk.bf16.mxu0 %vm671_vm1, %v1984_v14  ;;  %v3662_v14 = vld [vmem:[%s4550_s11 + $0x30] sm:$0xff]  }
 0x3da   : > { %2327 = vmatpush1.bf16.msra.mxu1 %v3654_v43 }
 0x3db   : > { %2328 = vmatprep.subr.bf16.mxu1 %v3743_v9 }
 0x3de   : > { %2329 = vmatpush1.bf16.msra.mxu1 %v3655_v44 }
 0x3df   : > { %2330 = vmatprep.subr.bf16.mxu1 %v3743_v9 }
 0x3e2   : > { %2331 = vmatpush1.bf16.msra.mxu1 %v3656_v33 }
 0x3e3   : > { %2340 = vmatprep.subr.bf16.mxu1 %v3743_v9 }
 0x3e6   : > { %2341 = vmatpush2.bf16.msra.mxu1 %v3657_v45 }
 0x3e7   : > { %2342 = vmatprep.subr.bf16.mxu1 %v3743_v9 }
 0x3ea   : > { %2343 = vmatpush2.bf16.msra.mxu1 %v3658_v46 }
 0x3eb   : > { %2344 = vmatprep.subr.bf16.mxu1 %v3743_v9 }
 0x3ee   : > { %2345 = vmatpush2.bf16.msra.mxu1 %v3659_v47 }
 0x3ef   : > { %2346 = vmatprep.subr.bf16.mxu1 %v3743_v9 }
 0x3f2   : > { %2347 = vmatpush2.bf16.msra.mxu1 %v3660_v3  ;;  %v3676_v3 = vld [vmem:[%s4552_s13] sm:$0xff]  }
 0x3f3   : > { %3522 = vmatprep.subr.bf16.mxu1 %v3737_v1 }
 0x448   : > { %v1976_v37 = vpop.permute.xlu0 %1975 }
 0x449   : > { %v1982_v38 = vsel %vm671_vm1, %v1968_v27, %v1976_v37  ;;  %v3667_v37 = vld [vmem:[%s4550_s11 + $0x8] sm:$0xff]  }
 0x44a   : > { %v1983_v39 = vpack.c.bf16 %v1982_v38, %v1982_v38  ;;  %v3668_v38 = vld [vmem:[%s4550_s11] sm:$0xff]  }
 0x44c   : > { %2124 = vmatmul.mubr.bf16.vlgmr.msra.gmra.mxu0 %v1983_v39  ;;  %v3669_v39 = vld [vmem:[%s4550_s11 + $0x58] sm:$0xff]  }
 0x44d   : > { %2509 = vmatpush1.bf16.msra.mxu0 %v3661_v35 }
 0x44e   : > { %2510 = vmatprep.subr.bf16.mxu0 %v3743_v9 }
 0x451   : > { %2511 = vmatpush1.bf16.msra.mxu0 %v3662_v14 }
 0x452   : > { %2512 = vmatprep.subr.bf16.mxu0 %v3743_v9 }
 0x455   : > { %2513 = vmatpush1.bf16.msra.mxu0 %v3663_v2 }
 0x456   : > { %2514 = vmatprep.subr.bf16.mxu0 %v3743_v9 }
 0x459   : > { %2515 = vmatpush1.bf16.msra.mxu0 %v3664_v16 }
 0x45a   : > { %2516 = vmatprep.subr.bf16.mxu0 %v3743_v9 }
 0x45d   : > { %2517 = vmatpush1.bf16.msra.mxu0 %v3665_v20 }
 0x45e   : > { %2518 = vmatprep.subr.bf16.mxu0 %v3743_v9 }
 0x461   : > { %2519 = vmatpush1.bf16.msra.mxu0 %v3666_v36  ;;  %v3683_v36 = vld [vmem:[%s4554_s15 + $0x7c] ss:$12 sps:$4 sm:$0xff]  }
 0x462   : > { %2520 = vmatprep.subr.bf16.mxu0 %v3743_v9 }
 0x465   : > { %2521 = vmatpush1.bf16.msra.mxu0 %v3667_v37  ;;  %v3681_v37 = vld [vmem:[%s4554_s15 + $0x78] ss:$12 sps:$4 sm:$0xff]  }
 0x466   : > { %2522 = vmatprep.subr.bf16.mxu0 %v3743_v9 }
 0x469   : > { %2523 = vmatpush1.bf16.msra.mxu0 %v3668_v38  ;;  %v3687_v38 = vld [vmem:[%s4554_s15 + $0x64] ss:$12 sps:$4 sm:$0xff]  }
 0x46a   : > { %2532 = vmatprep.subr.bf16.mxu0 %v3743_v9 }
 0x46d   : > { %2533 = vmatpush2.bf16.msra.mxu0 %v3669_v39  ;;  %v3685_v39 = vld [vmem:[%s4554_s15 + $0x60] ss:$12 sps:$4 sm:$0xff]  }
 0x46e   : > { %2534 = vmatprep.subr.bf16.mxu0 %v3743_v9 }
 0x471   : > { %2535 = vmatpush2.bf16.msra.mxu0 %v3670_v41  ;;  %v3691_v41 = vld [vmem:[%s4554_s15 + $0x4c] ss:$12 sps:$4 sm:$0xff]  }
 0x472   : > { %2536 = vmatprep.subr.bf16.mxu0 %v3743_v9 }
 0x475   : > { %2537 = vmatpush2.bf16.msra.mxu0 %v3671_v17  ;;  %v3695_v17 = vld [vmem:[%s4554_s15 + $0x34] ss:$12 sps:$4 sm:$0xff]  }
 0x476   : > { %2538 = vmatprep.subr.bf16.mxu0 %v3743_v9 }
 0x50c   : > { %v2125_v40 = vpop.f32.mrf.mxu0 }
 0x50d   : > { %v2126_v48 = vadd.f32 %v3301_v12, %v2125_v40 }
 0x50e   : > { %v2127_v49 = vpop.f32.mrf.mxu0 }
 0x50f   : > { %v2132_v51 = vcombine.high %v2126_v48, %v2126_v48  ;;  %v2139_v52 = vrot.slane %v2126_v48, %v3903_v15  ;;  %v3672_v48 = vld [vmem:[%s4550_s11 + $0x40] sm:$0xff]  }
 0x510   : > { %v2128_v53 = vpop.f32.mrf.mxu0  ;;  %2539 = vmatpush2.bf16.msra.mxu0 %v3672_v48  ;;  %v3705_v48 = vld [vmem:[%s4556_s17 + $0xb8] sm:$0xff]  }
 0x511   : > { %v2146_v54 = vrot.slane %v2132_v51, %v3903_v15  ;;  %v2147_v55 = vcombine.high %v2139_v52, %v2139_v52  ;;  %v3315_v23 = vrot.slane %v2139_v52, 9  ;;  %3534 = vmatprep.subr.bf16.mxu0 %v3737_v1 }
 0x512   : > { %v2129_v56 = vpop.f32.mrf.mxu0 }
 0x513   : > { %v2148_v57 = vcombine.high %v2146_v54, %v2146_v54  ;;  %v3316_v58 = vrot.slane %v2147_v55, 9  ;;  %v3317_v59 = vrot.slane %v2146_v54, 9  ;;  %v2165_v24 = vmax.f32 %v2139_v52, %v3315_v23  ;;  %v3673_v52 = vld [vmem:[%s4552_s13 + $0x18] sm:$0xff]  }
 0x515   : > { %v3318_v60 = vrot.slane %v2148_v57, 9  ;;  %v2166_v62 = vmax.f32 %v2147_v55, %v3316_v58  ;;  %v2167_v63 = vmax.f32 %v2146_v54, %v3317_v59  ;;  %v2169_v0 = vmax.f32 %v2165_v24, 0.0 }
 0x517   : > { %v2168_v4 = vmax.f32 %v2148_v57, %v3318_v60  ;;  %v2170_v5 = vmax.f32 %v2166_v62, 0.0  ;;  %v2171_v6 = vmax.f32 %v2167_v63, 0.0  ;;  %v2180_v8 = vrot.slane %v2169_v0, %v3910_v26  ;;  %v3674_v63 = vld [vmem:[%s4552_s13 + $0x10] sm:$0xff]   ;;  %v3675_v0 = vld [vmem:[%s4552_s13 + $0x8] sm:$0xff]  }
 0x519   : > { %v2172_v7 = vmax.f32 %v2168_v4, 0.0  ;;  %v2184_v10 = vrot.slane %v2170_v5, %v3910_v26  ;;  %v2188_v11 = vrot.slane %v2171_v6, %v3910_v26  ;;  %v3679_v4 = vld [vmem:[%s4554_s15 + $0x94] ss:$12 sps:$4 sm:$0x7f]   ;;  %v3744_v6 = vmov 65535  }
 0x51a   : > { %v3680_v5 = vld [vmem:[%s4554_s15 + $0x98] ss:$12 sps:$4 sm:$0x7f]  }
 0x51b   : > { %v2192_v18 = vrot.slane %v2172_v7, %v3910_v26  ;;  %v2193_v19 = vsel %vm1254_vm2, %v2184_v10, %v2180_v8  ;;  %v2790_v7 = vsel %vm1320_vm10, 4294967295, %v3744_v6  ;;  %v3724_v6 = vld [vmem:[%s4556_s17 + $0x48] sm:$0xff]  }
 0x51c   : > { %v2194_v21 = vsel %vm1256_vm3, %v2188_v11, %v2193_v19  ;;  %vm2390_vm3 = vcmask 1042432   ;;  %v2791_v8 = vsel %vm1298_vm11, %v2790_v7, 0  ;;  %v3688_v19 = vld [vmem:[%s4554_s15 + $0x68] ss:$12 sps:$4 sm:$0xff]  }
 0x51d   : > { %v2195_v22 = vsel %vm1258_vm4, %v2192_v18, %v2194_v21  ;;  %v2796_v10 = vand.u32 %v3679_v4, %v2791_v8  ;;  %v2799_v11 = vand.u32 %v3680_v5, %v2791_v8  ;;  %v3684_v18 = vld [vmem:[%s4554_s15 + $0x80] ss:$12 sps:$4 sm:$0xff]   ;;  %v3692_v21 = vld [vmem:[%s4554_s15 + $0x50] ss:$12 sps:$4 sm:$0xff]  }
 0x51e   : > { %v2197_v25 = vsel %vm1293_vm9, 0.0, %v2195_v22  ;;  %v3696_v22 = vld [vmem:[%s4554_s15 + $0x38] ss:$12 sps:$4 sm:$0xff]   ;;  %v3722_v4 = vld [vmem:[%s4556_s17 + $0x10] sm:$0xff]   ;;  %v3723_v5 = vld [vmem:[%s4556_s17 + $0x88] sm:$0xff]  }
 0x51f   : > { %v2199_v27 = vsel %vm2198_vm5, %v2197_v25, 0.0  ;;  %v3700_v25 = vld [vmem:[%s4554_s15 + $0x20] ss:$12 sps:$4 sm:$0xff]  }
 0x520   : > { %v2201_v28 = vrot.slane %v2199_v27, 1  ;;  %v2205_v29 = vrot.slane %v2199_v27, 2  ;;  %v3725_v7 = vld [vmem:[%s4556_s17 + $0x8] sm:$0xff]  }
 0x522   : > { %2202 = vrot.lane.b32.xlu1 %v2201_v28, %s3742_s26  ;;  %v2209_v30 = vpack.c.bf16 %v2205_v29, %v2205_v29 }
 0x524   : > { %3332 = vmatprep.mubr.msk.bf16.mxu1 %vm671_vm1, %v2209_v30 }
 0x594   : > { %v2203_v31 = vpop.permute.xlu1 %2202 }
 0x595   : > { %v2207_v32 = vsel %vm671_vm1, %v2199_v27, %v2203_v31  ;;  %v3335_v27 = vld [vmem:[%s4551_s12] ss:$0 sm:$0xff] }
 0x596   : > { %v2208_v34 = vpack.c.bf16 %v2207_v32, %v2207_v32 }
 0x598   : > { %2349 = vmatmul.mubr.bf16.vlgmr.msra.gmra.mxu1 %v2208_v34  ;;  %v3677_v34 = vld [vmem:[%s4554_s15 + $0x90] ss:$12 sps:$4 sm:$0x7f]  }
 0x599   : > { %3530 = vmatprep.mubr.msk.bf16.mxu1 %vm3738_vm0, %v3737_v1  ;;  %3523 = vmatpush3.bf16.msra.mxu1 %v3673_v52  ;;  %v2793_v16 = vand.u32 %v3677_v34, %v2791_v8  ;;  %v3709_v52 = vld [vmem:[%s4556_s17 + $0x70] sm:$0xff]   ;;  %v3726_v8 = vld [vmem:[%s4556_s17 + $0x80] sm:$0xff]  }
 0x59a   : > { %3524 = vmatprep.subr.bf16.mxu1 %v3737_v1 }
 0x59d   : > { %3525 = vmatpush3.bf16.msra.mxu1 %v3674_v63  ;;  %v3719_v63 = vld [vmem:[%s4556_s17 + $0x18] sm:$0xff]  }
 0x59e   : > { %3526 = vmatprep.subr.bf16.mxu1 %v3737_v1 }
 0x5a1   : > { %3527 = vmatpush3.bf16.msra.mxu1 %v3675_v0  ;;  %v3721_v0 = vld [vmem:[%s4556_s17 + $0x50] sm:$0xff]  }
 0x5a2   : > { %3528 = vmatprep.subr.bf16.mxu1 %v3737_v1 }
 0x5a5   : > { %3529 = vmatpush3.bf16.msra.mxu1 %v3676_v3  ;;  %v3720_v3 = vld [vmem:[%s4556_s17 + $0x90] sm:$0xff]  }
 0x5a6   : > { %2803 = vmatprep.subr.bf16.mxu1 %v2796_v10  ;;  %v3727_v10 = vld [vmem:[%s4556_s17 + $0x40] sm:$0xff]  }
 0x658   : > { %v2350_v61 = vpop.f32.mrf.mxu1 }
 0x659   : > { %v2351_v42 = vadd.f32 %v3319_v50, %v2350_v61  ;;  %v3693_v50 = vld [vmem:[%s4554_s15 + $0x30] ss:$12 sps:$4 sm:$0xff]  }
 0x65a   : > { %v2352_v43 = vpop.f32.mrf.mxu1  ;;  %v3699_v61 = vld [vmem:[%s4554_s15 + $0x1c] ss:$12 sps:$4 sm:$0xff]  }
 0x65b   : > { %v2363_v44 = vrot.slane %v2351_v42, %v3903_v15  ;;  %v3697_v42 = vld [vmem:[%s4554_s15 + $0x18] ss:$12 sps:$4 sm:$0xff]   ;;  %v3701_v43 = vld [vmem:[%s4554_s15] ss:$12 sps:$4 sm:$0xff]  }
 0x65c   : > { %v2353_v33 = vpop.f32.mrf.mxu1 }
 0x65d   : > { %v2364_v45 = vcombine.high %v2363_v44, %v2363_v44  ;;  %v3333_v46 = vrot.slane %v2363_v44, 9  ;;  %v3704_v33 = vld [vmem:[%s4554_s15 + $0x8] ss:$12 sps:$4 sm:$0xff]  }
 0x65e   : > { %v2354_v47 = vpop.f32.mrf.mxu1 }
 0x65f   : > { %v3334_v12 = vrot.slane %v2364_v45, 9  ;;  %v2373_v40 = vmax.f32 %v2363_v44, %v3333_v46  ;;  %v3703_v44 = vld [vmem:[%s4554_s15 + $0x4] ss:$12 sps:$4 sm:$0xff]   ;;  %v2563_v46 = vld [vmem:[%s4553_s14] sm:$0x1] }
 0x661   : > { %v2374_v49 = vmax.f32 %v2364_v45, %v3334_v12  ;;  %v2375_v51 = vmax.f32 %v2373_v40, 0.0  ;;  %v3706_v45 = vld [vmem:[%s4556_s17 + $0x78] sm:$0xff]  }
 0x663   : > { %v2376_v53 = vmax.f32 %v2374_v49, 0.0  ;;  %v2382_v15 = vrot.slane %v2375_v51, %v3910_v26  ;;  %v3707_v49 = vld [vmem:[%s4556_s17 + $0x38] sm:$0xff]  }
 0x665   : > { %v2386_v54 = vrot.slane %v2376_v53, %v3910_v26 }
 0x667   : > { %v2387_v55 = vsel %vm1254_vm2, %v2386_v54, %v2382_v15  ;;  %v3708_v54 = vld [vmem:[%s4556_s17 + $0xb0] sm:$0xff]  }
 0x668   : > { %v2389_v23 = vsel %vm1293_vm9, 0.0, %v2387_v55  ;;  %v3710_v55 = vld [vmem:[%s4556_s17 + $0x30] sm:$0xff]  }
 0x669   : > { %v2391_v56 = vsel %vm2390_vm3, %v2389_v23, 0.0  ;;  %v3712_v23 = vld [vmem:[%s4556_s17 + $0x68] sm:$0xff]  }
 0x66a   : > { %v2393_v57 = vrot.slane %v2391_v56, 1  ;;  %v2397_v58 = vrot.slane %v2391_v56, 2 }
 0x66c   : > { %2394 = vrot.lane.b32.xlu0 %v2393_v57, %s3742_s26  ;;  %v2401_v59 = vpack.c.bf16 %v2397_v58, %v2397_v58  ;;  %v3713_v57 = vld [vmem:[%s4556_s17 + $0x28] sm:$0xff]   ;;  %v3715_v58 = vld [vmem:[%s4556_s17 + $0x60] sm:$0xff]  }
 0x66e   : > { %3348 = vmatprep.mubr.msk.bf16.mxu0 %vm671_vm1, %v2401_v59  ;;  %v3714_v59 = vld [vmem:[%s4556_s17 + $0xa0] sm:$0xff]  }
 0x6de   : > { %v2395_v24 = vpop.permute.xlu0 %2394 }
 0x6df   : > { %v2399_v60 = vsel %vm671_vm1, %v2391_v56, %v2395_v24  ;;  %v3711_v56 = vld [vmem:[%s4556_s17 + $0xa8] sm:$0xff]   ;;  %v3716_v24 = vld [vmem:[%s4556_s17 + $0x20] sm:$0xff]  }
 0x6e0   : > { %v2400_v62 = vpack.c.bf16 %v2399_v60, %v2399_v60  ;;  %v3718_v60 = vld [vmem:[%s4556_s17 + $0x58] sm:$0xff]  }
 0x6e2   : > { %2541 = vmatmul.mubr.bf16.vlgmr.msra.gmra.mxu0 %v2400_v62  ;;  %v3717_v62 = vld [vmem:[%s4556_s17 + $0x98] sm:$0xff]  }
 0x6e3   : > { %3548 = vmatprep.mubr.msk.bf16.mxu0 %vm3738_vm0, %v3737_v1  ;;  %3535 = vmatpush3.bf16.msra.mxu0 %v2799_v11  ;;  %v3728_v11 = vld [vmem:[%s4556_s17] sm:$0xff]  }
 0x6e4   : > { %3536 = vmatprep.subr.bf16.mxu0 %v3737_v1 }
 0x6e7   : > { %3537 = vmatpush3.bf16.msra.mxu0 %v3684_v18  ;;  %v2781_v18 = vsub.s32 2, %v3895_v13 }
 0x6e8   : > { %3538 = vmatprep.subr.bf16.mxu0 %v3737_v1 }
 0x6eb   : > { %3539 = vmatpush3.bf16.msra.mxu0 %v3688_v19  ;;  %v2660_v19 = vld [vmem:[%s4555_s16] sm:$0x7] }
 0x6ec   : > { %3540 = vmatprep.subr.bf16.mxu0 %v3737_v1 }
 0x6ef   : > { %3541 = vmatpush3.bf16.msra.mxu0 %v3692_v21  ;;  %v2774_v21 = vrot.slane %v2660_v19, %v3910_v26 }
 0x6f0   : > { %3542 = vmatprep.subr.bf16.mxu0 %v3737_v1 }
 0x6f3   : > { %3543 = vmatpush3.bf16.msra.mxu0 %v3696_v22  ;;  %v2782_v22 = vrot.slane %v2660_v19, %v2781_v18 }
 0x6f4   : > { %3544 = vmatprep.subr.bf16.mxu0 %v3737_v1 }
 0x6f7   : > { %3545 = vmatpush3.bf16.msra.mxu0 %v3700_v25 }
 0x6f8   : > { %3546 = vmatprep.subr.bf16.mxu0 %v3737_v1 }
 0x6fb   : > { %3547 = vmatpush3.bf16.msra.mxu0 %v3704_v33 }
 0x6fc   : > { %3552 = vmatprep.subr.bf16.mxu0 %v3737_v1 }
 0x7a2   : > { %v2542_v28 = vpop.f32.mrf.mxu0 }
 0x7a3   : > { %v2543_v29 = vadd.f32 %v3335_v27, %v2542_v28 }
 0x7a4   : > { %v2544_v30 = vpop.f32.mrf.mxu0 }
 0x7a5   : > { %v2549_v31 = vrot.slane %v2543_v29, 1 }
 0x7a6   : > { %v2545_v32 = vpop.f32.mrf.mxu0 }
 0x7a7   : > { %v2551_v35 = vmax.f32 %v2543_v29, %v2549_v31 }
 0x7a8   : > { %v2546_v14 = vpop.f32.mrf.mxu0 }
 0x7a9   : > { %v2552_v2 = vmax.f32 %v2551_v35, 0.0 }
 0x7ab   : > { %v2554_v20 = vpack.c.bf16 %v2552_v2, %v2552_v2 }
 0x7ad   : > { %3531 = vmatmul.mubr.msk.bf16.vlgmr.msra.gmra.mxu1 %vm671_vm1, %v2554_v20  ;;  %vm2786_vm1 = vcmask 891904  }
 0x7ae   : > { %2804 = vmatpush1.bf16.msra.mxu1 %v2793_v16  ;;  %2833 = vmatprep.mubr.bf16.mxu1 %v3743_v9  ;;  %v3689_v9 = vld [vmem:[%s4554_s15 + $0x48] ss:$12 sps:$4 sm:$0xff]  }
 0x7af   : > { %2805 = vmatprep.subr.bf16.mxu1 %v3683_v36 }
 0x7b2   : > { %2806 = vmatpush1.bf16.msra.mxu1 %v3681_v37 }
 0x7b3   : > { %2807 = vmatprep.subr.bf16.mxu1 %v3687_v38 }
 0x7b6   : > { %2808 = vmatpush1.bf16.msra.mxu1 %v3685_v39 }
 0x7b7   : > { %2809 = vmatprep.subr.bf16.mxu1 %v3691_v41 }
 0x7ba   : > { %2810 = vmatpush1.bf16.msra.mxu1 %v3689_v9 }
 0x7bb   : > { %2811 = vmatprep.subr.bf16.mxu1 %v3695_v17 }
 0x7be   : > { %2812 = vmatpush1.bf16.msra.mxu1 %v3693_v50  ;;  %v2936_v50 = vld [vmem:[%s4557_s18] sm:$0x1] }
 0x7bf   : > { %2813 = vmatprep.subr.bf16.mxu1 %v3699_v61 }
 0x7c2   : > { %2814 = vmatpush1.bf16.msra.mxu1 %v3697_v42 }
 0x7c3   : > { %2815 = vmatprep.subr.bf16.mxu1 %v3703_v44 }
 0x7c6   : > { %2816 = vmatpush1.bf16.msra.mxu1 %v3701_v43 }
 0x7c7   : > { %3437 = vmatprep.subr.bf16.mxu1 %v3706_v45 }
 0x86d   : > { %v2625_v47 = vpop.f32.mrf.mxu1 }
 0x86e   : > { %v2626_v12 = vadd.f32 %v2625_v47, %v2563_v46 }
 0x86f   : > { %v3532_v40 = vpop.f32.mrf.mxu1 }
 0x870   : > { %v2631_v51 = vpack.c.bf16 %v2626_v12, %v2626_v12 }
 0x871   : > { %v2628_v53 = vpop.f32.mrf.mxu1 }
 0x872   : > { %3375 = vmatmul.mubr.msk.bf16.vlgmr.msra.gmra.mxu1 %vm2786_vm1, %v2631_v51  ;;  %3549 = vmatmul.mubr.msk.bf16.vlgmr.msra.gmra.mxu0 %vm2786_vm1, %v2631_v51 }
 0x873   : > { %v3533_v15 = vpop.f32.mrf.mxu1  ;;  %3553 = vmatpush3.bf16.msra.mxu0 %v3705_v48  ;;  %3438 = vmatpush3.bf16.msra.mxu1 %v3707_v49 }
 0x874   : > { %3554 = vmatprep.subr.bf16.mxu0 %v3737_v1  ;;  %3439 = vmatprep.subr.bf16.mxu1 %v3709_v52 }
 0x875   : > { %3568 = vmatprep.mubr.msk.bf16.mxu0 %vm3738_vm0, %v3737_v1  ;;  %vm3161_vm0 = vcmask 81920  }
 0x877   : > { %3555 = vmatpush3.bf16.msra.mxu0 %v3708_v54  ;;  %3440 = vmatpush3.bf16.msra.mxu1 %v3710_v55 }
 0x878   : > { %3556 = vmatprep.subr.bf16.mxu0 %v3737_v1  ;;  %3441 = vmatprep.subr.bf16.mxu1 %v3712_v23 }
 0x87b   : > { %3557 = vmatpush3.bf16.msra.mxu0 %v3711_v56  ;;  %3442 = vmatpush3.bf16.msra.mxu1 %v3713_v57 }
 0x87c   : > { %3558 = vmatprep.subr.bf16.mxu0 %v3737_v1  ;;  %3443 = vmatprep.subr.bf16.mxu1 %v3715_v58 }
 0x87f   : > { %3559 = vmatpush3.bf16.msra.mxu0 %v3714_v59  ;;  %3444 = vmatpush3.bf16.msra.mxu1 %v3716_v24 }
 0x880   : > { %3560 = vmatprep.subr.bf16.mxu0 %v3737_v1  ;;  %3445 = vmatprep.subr.bf16.mxu1 %v3718_v60 }
 0x883   : > { %3561 = vmatpush3.bf16.msra.mxu0 %v3717_v62  ;;  %3446 = vmatpush3.bf16.msra.mxu1 %v3719_v63 }
 0x884   : > { %3562 = vmatprep.subr.bf16.mxu0 %v3737_v1  ;;  %3447 = vmatprep.subr.bf16.mxu1 %v3721_v0 }
 0x887   : > { %3563 = vmatpush3.bf16.msra.mxu0 %v3720_v3  ;;  %3448 = vmatpush3.bf16.msra.mxu1 %v3722_v4 }
 0x888   : > { %3564 = vmatprep.subr.bf16.mxu0 %v3737_v1  ;;  %3449 = vmatprep.subr.bf16.mxu1 %v3724_v6 }
 0x88b   : > { %3565 = vmatpush3.bf16.msra.mxu0 %v3723_v5  ;;  %3450 = vmatpush3.bf16.msra.mxu1 %v3725_v7 }
 0x88c   : > { %3566 = vmatprep.subr.bf16.mxu0 %v3737_v1  ;;  %3451 = vmatprep.subr.bf16.mxu1 %v3727_v10  ;;  %v2777_v1 = vsub.s32 1, %v3895_v13 }
 0x88e   : > { %v2778_v25 = vrot.slane %v2660_v19, %v2777_v1 }
 0x88f   : > { %3567 = vmatpush3.bf16.msra.mxu0 %v3726_v8  ;;  %3452 = vmatpush3.bf16.msra.mxu1 %v3728_v11 }
 0x932   : > { %v2835_v27 = vpop.f32.mrf.mxu1  ;;  %v2876_v28 = vpop.f32.mrf.mxu0 }
 0x933   : > { %v2836_v29 = vadd.f32 %v2835_v27, %v2774_v21  ;;  %v2877_v30 = vadd.f32 %v2876_v28, %v2782_v22 }
 0x934   : > { %v2837_v31 = vpop.f32.mrf.mxu1  ;;  %v3550_v32 = vpop.f32.mrf.mxu0 }
 0x935   : > { %v2884_v34 = vmax.f32 %v2877_v30, 0.0  ;;  %v2838_v35 = vadd.f32 %v2837_v31, %v2778_v25  ;;  %v2882_v14 = vmax.f32 %v2836_v29, 0.0 }
 0x936   : > { %v2839_v2 = vpop.f32.mrf.mxu1  ;;  %v2879_v16 = vpop.f32.mrf.mxu0 }
 0x937   : > { %v2887_v20 = vpack.c.bf16 %v2884_v34, %v2884_v34  ;;  %v2883_v36 = vmax.f32 %v2838_v35, 0.0  ;;  %v2885_v26 = vpack.c.bf16 %v2882_v14, %v2882_v14 }
 0x938   : > { %v2840_v37 = vpop.f32.mrf.mxu1  ;;  %v3551_v38 = vpop.f32.mrf.mxu0 }
 0x939   : > { %v2886_v13 = vpack.c.bf16 %v2883_v36, %v2883_v36  ;;  %3569 = vmatmul.mubr.bf16.vlgmr.msra.gmra.mxu0 %v2887_v20 }
 0x93b   : > { %3113 = vmatprep.mubr.bf16.mxu1 %v2886_v13 }
 0x93c   : > { %3114 = vmatmul.mubr.bf16.vlgmr.msra.gmra.mxu1 %v2885_v26 }
 0x9f9   : > { %v3155_v39 = vpop.f32.mrf.mxu0 }
 0x9fb   : > { %v3570_v41 = vpop.f32.mrf.mxu0 }
 0x9fc   : > { %v3453_v9 = vpop.f32.mrf.mxu1 }
 0x9fd   : > { %v3158_v17 = vpop.f32.mrf.mxu0 }
 0x9fe   : > { %v3454_v61 = vpop.f32.mrf.mxu1 }
 0x9ff   : > { %v3455_v42 = vadd.f32 %v3454_v61, %v3453_v9  ;;  %v3571_v43 = vpop.f32.mrf.mxu0 }
 0xa00   : > { %v3456_v44 = vpop.f32.mrf.mxu1 }
 0xa01   : > { %v3116_v33 = vadd.f32 %v3455_v42, %v2936_v50 }
 0xa02   : > { %v3457_v45 = vpop.f32.mrf.mxu1 }
 0xa03   : > { %v3156_v46 = vadd.f32 %v3155_v39, %v3116_v33 }
 0xa05   : > { %3162 = vst.msk [vmem:[%s598_s2] sm:$0x1] %vm3161_vm0, %v3156_v46 }
 0xa06 PF: > { %s29_s0 = sadd.s32 1, %s3735_s0  }
 0xa07   : > { %p26_p4 = scmp.ge.s32.totalorder %s29_s0, 4  }
 0xa09   :  { %28 = sbr.rel (!%p26_p4) target bundleno = 5 (0x5), region = 126 }

</bundles_post_ra>
